<compile_context>
chip_gen: v6e
topology: v6e:2x2x1
jax: 0.10.0
libtpu: 0.0.40
codegen_flags: <defaults>
</compile_context>

<pallas_src>
import functools
import math

import jax
import jax.numpy as jnp
import numpy as np
from jax.experimental import pallas as pl
from jax.experimental.pallas import tpu as pltpu


def _cross_attention_kernel(x_ref, y_ref,
                            wq_ref, bq_ref,
                            wkv_ref, bkv_ref,
                            wo_ref, bo_ref,
                            o_ref, acc_ref,
                            *, n_heads, d_head, bblk, sq, skv):
    d_emb = wq_ref.shape[1]
    d_cr = y_ref.shape[-1]
    scale = 1.0 / math.sqrt(d_head)

    # Flatten the batch block so the projection matmuls have a large M dim.
    xf = x_ref[...].reshape(bblk * sq, d_emb)     # bf16 (rows_q, d_emb)
    yf = y_ref[...].reshape(bblk * skv, d_cr)     # bf16 (rows_kv, d_cr)

    # Q projection: one big MXU matmul, f32 accumulate; fold in the 1/sqrt(dh) scale
    # while still in f32, then drop to bf16 for the score matmuls.
    q = jnp.dot(xf, wq_ref[...], preferred_element_type=jnp.float32) + bq_ref[...]
    q = (q * scale).astype(jnp.bfloat16)          # (rows_q, d_emb)

    # Fused K/V projection: one MXU pass producing (rows_kv, 2*d_emb).
    kv = jnp.dot(yf, wkv_ref[...], preferred_element_type=jnp.float32) + bkv_ref[...]
    k = kv[:, :d_emb].astype(jnp.bfloat16)        # lane-aligned split (d_emb % 128 == 0)
    v = kv[:, d_emb:].astype(jnp.bfloat16)

    # Zero the f32 output accumulator (scratch persists across grid steps).
    acc_ref[...] = jnp.zeros_like(acc_ref)

    for b in range(bblk):                         # static, unrolled
        q_b = q[b * sq:(b + 1) * sq, :]           # (sq, d_emb)   sublane-aligned rows
        # One transpose per batch element, reused by all heads; per-head K slices
        # below are then sublane slices (cheap) instead of per-head XLU transposes.
        kT_b = k[b * skv:(b + 1) * skv, :].T      # (d_emb, skv)
        v_b = v[b * skv:(b + 1) * skv, :]         # (skv, d_emb)

        for h in range(n_heads):                  # static, unrolled
            sl = slice(h * d_head, (h + 1) * d_head)
            qh = q_b[:, sl]                       # (sq, dh)
            khT = kT_b[sl, :]                     # (dh, skv)  sublane slice

            # scores: plain (M,K)x(K,N) MXU matmul, f32 accumulation.
            s = jnp.dot(qh, khT, preferred_element_type=jnp.float32)   # (sq, skv)

            # numerically stable softmax over keys, all in f32.
            m = jnp.max(s, axis=-1, keepdims=True)
            e = jnp.exp(s - m)
            p = e * pl.reciprocal(jnp.sum(e, axis=-1, keepdims=True), approx=True)

            ctx = jnp.dot(p.astype(jnp.bfloat16), v_b[:, sl],
                          preferred_element_type=jnp.float32)          # (sq, dh)

            # Per-head output projection, accumulated in place: Wo is sliced on the
            # sublane axis, no concat of head outputs, bounded live ranges.
            acc_ref[b * sq:(b + 1) * sq, :] += jnp.dot(
                ctx.astype(jnp.bfloat16), wo_ref[sl, :],
                preferred_element_type=jnp.float32)

    out = acc_ref[...] + bo_ref[...]
    o_ref[...] = out.reshape(bblk, sq, d_emb).astype(o_ref.dtype)


def _choose_block_batch(B, Sq, target_rows=256):
    """Pick how many batch elements to process per grid step.

    Targets >=~128-256 projection rows per step (amortizes ~0.35us/step overhead and
    fills the MXU M-dim), while keeping >=2 grid steps when that still leaves >=128
    rows per step (so dimension_semantics=("parallel",) can shard across v7x's 2 TCs).
    """
    bblk = min(B, max(1, (target_rows + Sq - 1) // Sq))
    if B // bblk < 2:
        half = max(1, B // 2)
        if half * Sq >= 128:
            bblk = half
    while B % bblk:      # require full blocks
        bblk -= 1
    return bblk


def atencao_cruzada_pallas(x, y, params, n_heads):
    B, Sq, d_emb = x.shape
    _, Skv, d_cr = y.shape
    d_head = d_emb // n_heads
    wq, bq, wk, bk, wv, bv, wo, bo = params

    # bf16 operands (MXU-native on v6e/v7x; halves resident-weight VMEM, which is what
    # matters on v7x's 64 MiB VMEM).  Biases stay f32 (tiny, added post-accumulation).
    xb = x.astype(jnp.bfloat16)
    yb = y.astype(jnp.bfloat16)
    wq_b = wq.astype(jnp.bfloat16)
    wo_b = wo.astype(jnp.bfloat16)
    wkv_b = jnp.concatenate([wk, wv], axis=1).astype(jnp.bfloat16)   # fused K/V weight
    bq32 = bq.astype(jnp.float32)
    bkv32 = jnp.concatenate([bk, bv], axis=1).astype(jnp.float32)
    bo32 = bo.astype(jnp.float32)

    bblk = _choose_block_batch(B, Sq)
    grid = (B // bblk,)

    # VMEM budget (resident, weights single-copy worth): Wq + Wkv + Wo in bf16 plus
    # double-buffered x/y/out tiles and the f32 accumulator — well under the 32 MiB
    # default scoped limit at these shapes, so vmem_limit_bytes is left unset.
    kernel = functools.partial(_cross_attention_kernel,
                               n_heads=n_heads, d_head=d_head,
                               bblk=bblk, sq=Sq, skv=Skv)
    const = lambda b: (0, 0)

    return pl.pallas_call(
        kernel,
        out_shape=jax.ShapeDtypeStruct((B, Sq, d_emb), x.dtype),
        grid_spec=pltpu.PrefetchScalarGridSpec(
            num_scalar_prefetch=0,
            grid=grid,
            in_specs=[
                pl.BlockSpec((bblk, Sq, d_emb), lambda b: (b, 0, 0)),   # x (batch block)
                pl.BlockSpec((bblk, Skv, d_cr), lambda b: (b, 0, 0)),   # y (batch block)
                pl.BlockSpec((d_emb, d_emb), const),                    # Wq
                pl.BlockSpec((1, d_emb), const),                        # bq
                pl.BlockSpec((d_cr, 2 * d_emb), const),                 # Wkv (fused K,V)
                pl.BlockSpec((1, 2 * d_emb), const),                    # bkv
                pl.BlockSpec((d_emb, d_emb), const),                    # Wo
                pl.BlockSpec((1, d_emb), const),                        # bo
            ],
            out_specs=pl.BlockSpec((bblk, Sq, d_emb), lambda b: (b, 0, 0)),
            scratch_shapes=[pltpu.VMEM((bblk * Sq, d_emb), jnp.float32)],
        ),
        compiler_params=pltpu.CompilerParams(
            dimension_semantics=("parallel",)),
    )(xb, yb, wq_b, bq32, wkv_b, bkv32, wo_b, bo32)


def atencao_cruzada_reference(x, y, params, n_heads):
    """Pure-JAX (f32) replica of the PyTorch forward for verification."""
    wq, bq, wk, bk, wv, bv, wo, bo = params
    B, Sq, d_emb = x.shape
    d_head = d_emb // n_heads

    q = x @ wq + bq
    k = y @ wk + bk
    v = y @ wv + bv

    def split(t):
        Bt, St, _ = t.shape
        return t.reshape(Bt, St, n_heads, d_head).transpose(0, 2, 1, 3)

    q, k, v = map(split, (q, k, v))
    s = jnp.einsum('bhqd,bhkd->bhqk', q, k) / math.sqrt(d_head)
    p = jax.nn.softmax(s, axis=-1)
    o = jnp.einsum('bhqk,bhkd->bhqd', p, v)
    o = o.transpose(0, 2, 1, 3).reshape(B, Sq, d_emb)
    return o @ wo + bo


if __name__ == "__main__":
    # Small shapes consistent with the module's forward.
    B, Sq, Skv = 2, 8, 16
    d_emb, d_cruzada, n_heads = 128, 64, 4

    key = jax.random.PRNGKey(0)
    ks = jax.random.split(key, 10)

    # Deterministic synthetic parameters (math layout: (in, out); biases (1, out)).
    wq = jax.random.normal(ks[0], (d_emb, d_emb), jnp.float32) * 0.05
    bq = jax.random.normal(ks[1], (1, d_emb), jnp.float32) * 0.05
    wk = jax.random.normal(ks[2], (d_cruzada, d_emb), jnp.float32) * 0.05
    bk = jax.random.normal(ks[3], (1, d_emb), jnp.float32) * 0.05
    wv = jax.random.normal(ks[4], (d_cruzada, d_emb), jnp.float32) * 0.05
    bv = jax.random.normal(ks[5], (1, d_emb), jnp.float32) * 0.05
    wo = jax.random.normal(ks[6], (d_emb, d_emb), jnp.float32) * 0.05
    bo = jax.random.normal(ks[7], (1, d_emb), jnp.float32) * 0.05
    params = (wq, bq, wk, bk, wv, bv, wo, bo)

    x = jax.random.normal(ks[8], (B, Sq, d_emb), jnp.float32)
    y = jax.random.normal(ks[9], (B, Skv, d_cruzada), jnp.float32)

    out = atencao_cruzada_pallas(x, y, params, n_heads)
    out = jax.block_until_ready(out)

    ref = atencao_cruzada_reference(x, y, params, n_heads)
    # bf16 operands inside the kernel -> loosened tolerances vs. the f32 reference.
    np.testing.assert_allclose(np.asarray(out), np.asarray(ref),
                               rtol=2e-2, atol=2e-2)
    print("KERNEL_OK")
</pallas_src>

<mosaic_0001>
module attributes {stable_mosaic.version = 11 : i64} {
  func.func @_cross_attention_kernel(%arg0: i32, %arg1: memref<2x8x128xbf16, #tpu.memory_space<vmem>>, %arg2: memref<2x16x64xbf16, #tpu.memory_space<vmem>>, %arg3: memref<128x128xbf16, #tpu.memory_space<vmem>>, %arg4: memref<1x128xf32, #tpu.memory_space<vmem>>, %arg5: memref<64x256xbf16, #tpu.memory_space<vmem>>, %arg6: memref<1x256xf32, #tpu.memory_space<vmem>>, %arg7: memref<128x128xbf16, #tpu.memory_space<vmem>>, %arg8: memref<1x128xf32, #tpu.memory_space<vmem>>, %arg9: memref<2x8x128xf32, #tpu.memory_space<vmem>>, %arg10: memref<16x128xf32, #tpu.memory_space<vmem>>) attributes {dimension_semantics = [#tpu.dimension_semantics<parallel>], iteration_bounds = array<i64: 1>, scalar_prefetch = 0 : i64, scratch_operands = 1 : i64, tpu.core_type = #tpu.core_type<tc>, window_params = [{transform_indices = @transform_0, window_bounds = array<i64: 2, 8, 128>}, {transform_indices = @transform_1, window_bounds = array<i64: 2, 16, 64>}, {pipeline_mode = #tpu.pipeline_mode<synchronous>, transform_indices = @transform_2, window_bounds = array<i64: 128, 128>}, {pipeline_mode = #tpu.pipeline_mode<synchronous>, transform_indices = @transform_3, window_bounds = array<i64: 1, 128>}, {pipeline_mode = #tpu.pipeline_mode<synchronous>, transform_indices = @transform_4, window_bounds = array<i64: 64, 256>}, {pipeline_mode = #tpu.pipeline_mode<synchronous>, transform_indices = @transform_5, window_bounds = array<i64: 1, 256>}, {pipeline_mode = #tpu.pipeline_mode<synchronous>, transform_indices = @transform_6, window_bounds = array<i64: 128, 128>}, {pipeline_mode = #tpu.pipeline_mode<synchronous>, transform_indices = @transform_7, window_bounds = array<i64: 1, 128>}, {transform_indices = @transform_8, window_bounds = array<i64: 2, 8, 128>}]} {
    %c0 = arith.constant 0 : index
    %c0_0 = arith.constant 0 : index
    %c0_1 = arith.constant 0 : index
    %0 = vector.load %arg1[%c0, %c0_0, %c0_1] : memref<2x8x128xbf16, #tpu.memory_space<vmem>>, vector<2x8x128xbf16>
    %1 = vector.shape_cast %0 : vector<2x8x128xbf16> to vector<16x128xbf16>
    %c0_2 = arith.constant 0 : index
    %c0_3 = arith.constant 0 : index
    %c0_4 = arith.constant 0 : index
    %2 = vector.load %arg2[%c0_2, %c0_3, %c0_4] : memref<2x16x64xbf16, #tpu.memory_space<vmem>>, vector<2x16x64xbf16>
    %3 = vector.shape_cast %2 : vector<2x16x64xbf16> to vector<32x64xbf16>
    %c0_5 = arith.constant 0 : index
    %c0_6 = arith.constant 0 : index
    %4 = vector.load %arg3[%c0_5, %c0_6] : memref<128x128xbf16, #tpu.memory_space<vmem>>, vector<128x128xbf16>
    %cst = arith.constant dense<0.000000e+00> : vector<16x128xf32>
    %5 = tpu.matmul %1, %4, %cst {dimension_numbers = #tpu.dot_dimension_numbers<[1], [0], [0], [1], [0, 0, 1, 1], [], []>} : vector<16x128xbf16>, vector<128x128xbf16>, vector<16x128xf32> -> vector<16x128xf32>
    %c0_7 = arith.constant 0 : index
    %c0_8 = arith.constant 0 : index
    %6 = vector.load %arg4[%c0_7, %c0_8] : memref<1x128xf32, #tpu.memory_space<vmem>>, vector<1x128xf32>
    %7 = vector.broadcast %6 : vector<1x128xf32> to vector<16x128xf32>
    %8 = arith.addf %5, %7 : vector<16x128xf32>
    %cst_9 = arith.constant 0.176776692 : f32
    %9 = vector.broadcast %cst_9 : f32 to vector<16x128xf32>
    %10 = arith.mulf %8, %9 : vector<16x128xf32>
    %11 = arith.truncf %10 : vector<16x128xf32> to vector<16x128xbf16>
    %c0_10 = arith.constant 0 : index
    %c0_11 = arith.constant 0 : index
    %12 = vector.load %arg5[%c0_10, %c0_11] : memref<64x256xbf16, #tpu.memory_space<vmem>>, vector<64x256xbf16>
    %cst_12 = arith.constant dense<0.000000e+00> : vector<32x256xf32>
    %13 = tpu.matmul %3, %12, %cst_12 {dimension_numbers = #tpu.dot_dimension_numbers<[1], [0], [0], [1], [0, 0, 1, 1], [], []>} : vector<32x64xbf16>, vector<64x256xbf16>, vector<32x256xf32> -> vector<32x256xf32>
    %c0_13 = arith.constant 0 : index
    %c0_14 = arith.constant 0 : index
    %14 = vector.load %arg6[%c0_13, %c0_14] : memref<1x256xf32, #tpu.memory_space<vmem>>, vector<1x256xf32>
    %15 = vector.broadcast %14 : vector<1x256xf32> to vector<32x256xf32>
    %16 = arith.addf %13, %15 : vector<32x256xf32>
    %17 = vector.extract_strided_slice %16 {offsets = [0, 0], sizes = [32, 128], strides = [1, 1]} : vector<32x256xf32> to vector<32x128xf32>
    %18 = arith.truncf %17 : vector<32x128xf32> to vector<32x128xbf16>
    %19 = vector.extract_strided_slice %16 {offsets = [0, 128], sizes = [32, 128], strides = [1, 1]} : vector<32x256xf32> to vector<32x128xf32>
    %20 = arith.truncf %19 : vector<32x128xf32> to vector<32x128xbf16>
    %cst_15 = arith.constant 0.000000e+00 : f32
    %21 = vector.broadcast %cst_15 : f32 to vector<16x128xf32>
    %c0_16 = arith.constant 0 : index
    %c0_17 = arith.constant 0 : index
    %22 = vector.load %arg10[%c0_16, %c0_17] : memref<16x128xf32, #tpu.memory_space<vmem>>, vector<16x128xf32>
    tpu.vector_store %arg10[%c0_16, %c0_17], %21 {strides = array<i32>} : memref<16x128xf32, #tpu.memory_space<vmem>>, vector<16x128xf32>,
    %23 = vector.extract_strided_slice %11 {offsets = [0, 0], sizes = [8, 128], strides = [1, 1]} : vector<16x128xbf16> to vector<8x128xbf16>
    %24 = vector.extract_strided_slice %18 {offsets = [0, 0], sizes = [16, 128], strides = [1, 1]} : vector<32x128xbf16> to vector<16x128xbf16>
    %25 = tpu.transpose %24, [1, 0] : vector<16x128xbf16> -> vector<128x16xbf16>
    %26 = vector.extract_strided_slice %20 {offsets = [0, 0], sizes = [16, 128], strides = [1, 1]} : vector<32x128xbf16> to vector<16x128xbf16>
    %27 = vector.extract_strided_slice %23 {offsets = [0, 0], sizes = [8, 32], strides = [1, 1]} : vector<8x128xbf16> to vector<8x32xbf16>
    %28 = vector.extract_strided_slice %25 {offsets = [0, 0], sizes = [32, 16], strides = [1, 1]} : vector<128x16xbf16> to vector<32x16xbf16>
    %cst_18 = arith.constant dense<0.000000e+00> : vector<8x16xf32>
    %29 = tpu.matmul %27, %28, %cst_18 {dimension_numbers = #tpu.dot_dimension_numbers<[1], [0], [0], [1], [0, 0, 1, 1], [], []>} : vector<8x32xbf16>, vector<32x16xbf16>, vector<8x16xf32> -> vector<8x16xf32>
    %cst_19 = arith.constant dense<0xFF800000> : vector<8xf32>
    %30 = vector.multi_reduction <maximumf>, %29, %cst_19 [1] : vector<8x16xf32> to vector<8xf32>
    %31 = vector.shape_cast %30 : vector<8xf32> to vector<8x1xf32>
    %32 = vector.broadcast %31 : vector<8x1xf32> to vector<8x16xf32>
    %33 = arith.subf %29, %32 : vector<8x16xf32>
    %34 = math.exp %33 : vector<8x16xf32>
    %cst_20 = arith.constant dense<0.000000e+00> : vector<8xf32>
    %35 = vector.multi_reduction <add>, %34, %cst_20 [1] : vector<8x16xf32> to vector<8xf32>
    %36 = vector.shape_cast %35 : vector<8xf32> to vector<8x1xf32>
    %37 = tpu.reciprocal %36 {approx = true} : vector<8x1xf32> -> vector<8x1xf32>
    %38 = vector.broadcast %37 : vector<8x1xf32> to vector<8x16xf32>
    %39 = arith.mulf %34, %38 : vector<8x16xf32>
    %40 = arith.truncf %39 : vector<8x16xf32> to vector<8x16xbf16>
    %41 = vector.extract_strided_slice %26 {offsets = [0, 0], sizes = [16, 32], strides = [1, 1]} : vector<16x128xbf16> to vector<16x32xbf16>
    %cst_21 = arith.constant dense<0.000000e+00> : vector<8x32xf32>
    %42 = tpu.matmul %40, %41, %cst_21 {dimension_numbers = #tpu.dot_dimension_numbers<[1], [0], [0], [1], [0, 0, 1, 1], [], []>} : vector<8x16xbf16>, vector<16x32xbf16>, vector<8x32xf32> -> vector<8x32xf32>
    %c0_22 = arith.constant 0 : index
    %c0_23 = arith.constant 0 : index
    %43 = vector.load %arg10[%c0_22, %c0_23] : memref<16x128xf32, #tpu.memory_space<vmem>>, vector<8x128xf32>
    %44 = arith.truncf %42 : vector<8x32xf32> to vector<8x32xbf16>
    %c0_24 = arith.constant 0 : index
    %c0_25 = arith.constant 0 : index
    %45 = vector.load %arg7[%c0_24, %c0_25] : memref<128x128xbf16, #tpu.memory_space<vmem>>, vector<32x128xbf16>
    %cst_26 = arith.constant dense<0.000000e+00> : vector<8x128xf32>
    %46 = tpu.matmul %44, %45, %cst_26 {dimension_numbers = #tpu.dot_dimension_numbers<[1], [0], [0], [1], [0, 0, 1, 1], [], []>} : vector<8x32xbf16>, vector<32x128xbf16>, vector<8x128xf32> -> vector<8x128xf32>
    %47 = arith.addf %43, %46 : vector<8x128xf32>
    %c0_27 = arith.constant 0 : index
    %c0_28 = arith.constant 0 : index
    %48 = vector.load %arg10[%c0_27, %c0_28] : memref<16x128xf32, #tpu.memory_space<vmem>>, vector<8x128xf32>
    tpu.vector_store %arg10[%c0_27, %c0_28], %47 {strides = array<i32>} : memref<16x128xf32, #tpu.memory_space<vmem>>, vector<8x128xf32>,
    %49 = vector.extract_strided_slice %23 {offsets = [0, 32], sizes = [8, 32], strides = [1, 1]} : vector<8x128xbf16> to vector<8x32xbf16>
    %50 = vector.extract_strided_slice %25 {offsets = [32, 0], sizes = [32, 16], strides = [1, 1]} : vector<128x16xbf16> to vector<32x16xbf16>
    %cst_29 = arith.constant dense<0.000000e+00> : vector<8x16xf32>
    %51 = tpu.matmul %49, %50, %cst_29 {dimension_numbers = #tpu.dot_dimension_numbers<[1], [0], [0], [1], [0, 0, 1, 1], [], []>} : vector<8x32xbf16>, vector<32x16xbf16>, vector<8x16xf32> -> vector<8x16xf32>
    %cst_30 = arith.constant dense<0xFF800000> : vector<8xf32>
    %52 = vector.multi_reduction <maximumf>, %51, %cst_30 [1] : vector<8x16xf32> to vector<8xf32>
    %53 = vector.shape_cast %52 : vector<8xf32> to vector<8x1xf32>
    %54 = vector.broadcast %53 : vector<8x1xf32> to vector<8x16xf32>
    %55 = arith.subf %51, %54 : vector<8x16xf32>
    %56 = math.exp %55 : vector<8x16xf32>
    %cst_31 = arith.constant dense<0.000000e+00> : vector<8xf32>
    %57 = vector.multi_reduction <add>, %56, %cst_31 [1] : vector<8x16xf32> to vector<8xf32>
    %58 = vector.shape_cast %57 : vector<8xf32> to vector<8x1xf32>
    %59 = tpu.reciprocal %58 {approx = true} : vector<8x1xf32> -> vector<8x1xf32>
    %60 = vector.broadcast %59 : vector<8x1xf32> to vector<8x16xf32>
    %61 = arith.mulf %56, %60 : vector<8x16xf32>
    %62 = arith.truncf %61 : vector<8x16xf32> to vector<8x16xbf16>
    %63 = vector.extract_strided_slice %26 {offsets = [0, 32], sizes = [16, 32], strides = [1, 1]} : vector<16x128xbf16> to vector<16x32xbf16>
    %cst_32 = arith.constant dense<0.000000e+00> : vector<8x32xf32>
    %64 = tpu.matmul %62, %63, %cst_32 {dimension_numbers = #tpu.dot_dimension_numbers<[1], [0], [0], [1], [0, 0, 1, 1], [], []>} : vector<8x16xbf16>, vector<16x32xbf16>, vector<8x32xf32> -> vector<8x32xf32>
    %c0_33 = arith.constant 0 : index
    %c0_34 = arith.constant 0 : index
    %65 = vector.load %arg10[%c0_33, %c0_34] : memref<16x128xf32, #tpu.memory_space<vmem>>, vector<8x128xf32>
    %66 = arith.truncf %64 : vector<8x32xf32> to vector<8x32xbf16>
    %c32 = arith.constant 32 : index
    %c0_35 = arith.constant 0 : index
    %67 = vector.load %arg7[%c32, %c0_35] : memref<128x128xbf16, #tpu.memory_space<vmem>>, vector<32x128xbf16>
    %cst_36 = arith.constant dense<0.000000e+00> : vector<8x128xf32>
    %68 = tpu.matmul %66, %67, %cst_36 {dimension_numbers = #tpu.dot_dimension_numbers<[1], [0], [0], [1], [0, 0, 1, 1], [], []>} : vector<8x32xbf16>, vector<32x128xbf16>, vector<8x128xf32> -> vector<8x128xf32>
    %69 = arith.addf %65, %68 : vector<8x128xf32>
    %c0_37 = arith.constant 0 : index
    %c0_38 = arith.constant 0 : index
    %70 = vector.load %arg10[%c0_37, %c0_38] : memref<16x128xf32, #tpu.memory_space<vmem>>, vector<8x128xf32>
    tpu.vector_store %arg10[%c0_37, %c0_38], %69 {strides = array<i32>} : memref<16x128xf32, #tpu.memory_space<vmem>>, vector<8x128xf32>,
    %71 = vector.extract_strided_slice %23 {offsets = [0, 64], sizes = [8, 32], strides = [1, 1]} : vector<8x128xbf16> to vector<8x32xbf16>
    %72 = vector.extract_strided_slice %25 {offsets = [64, 0], sizes = [32, 16], strides = [1, 1]} : vector<128x16xbf16> to vector<32x16xbf16>
    %cst_39 = arith.constant dense<0.000000e+00> : vector<8x16xf32>
    %73 = tpu.matmul %71, %72, %cst_39 {dimension_numbers = #tpu.dot_dimension_numbers<[1], [0], [0], [1], [0, 0, 1, 1], [], []>} : vector<8x32xbf16>, vector<32x16xbf16>, vector<8x16xf32> -> vector<8x16xf32>
    %cst_40 = arith.constant dense<0xFF800000> : vector<8xf32>
    %74 = vector.multi_reduction <maximumf>, %73, %cst_40 [1] : vector<8x16xf32> to vector<8xf32>
    %75 = vector.shape_cast %74 : vector<8xf32> to vector<8x1xf32>
    %76 = vector.broadcast %75 : vector<8x1xf32> to vector<8x16xf32>
    %77 = arith.subf %73, %76 : vector<8x16xf32>
    %78 = math.exp %77 : vector<8x16xf32>
    %cst_41 = arith.constant dense<0.000000e+00> : vector<8xf32>
    %79 = vector.multi_reduction <add>, %78, %cst_41 [1] : vector<8x16xf32> to vector<8xf32>
    %80 = vector.shape_cast %79 : vector<8xf32> to vector<8x1xf32>
    %81 = tpu.reciprocal %80 {approx = true} : vector<8x1xf32> -> vector<8x1xf32>
    %82 = vector.broadcast %81 : vector<8x1xf32> to vector<8x16xf32>
    %83 = arith.mulf %78, %82 : vector<8x16xf32>
    %84 = arith.truncf %83 : vector<8x16xf32> to vector<8x16xbf16>
    %85 = vector.extract_strided_slice %26 {offsets = [0, 64], sizes = [16, 32], strides = [1, 1]} : vector<16x128xbf16> to vector<16x32xbf16>
    %cst_42 = arith.constant dense<0.000000e+00> : vector<8x32xf32>
    %86 = tpu.matmul %84, %85, %cst_42 {dimension_numbers = #tpu.dot_dimension_numbers<[1], [0], [0], [1], [0, 0, 1, 1], [], []>} : vector<8x16xbf16>, vector<16x32xbf16>, vector<8x32xf32> -> vector<8x32xf32>
    %c0_43 = arith.constant 0 : index
    %c0_44 = arith.constant 0 : index
    %87 = vector.load %arg10[%c0_43, %c0_44] : memref<16x128xf32, #tpu.memory_space<vmem>>, vector<8x128xf32>
    %88 = arith.truncf %86 : vector<8x32xf32> to vector<8x32xbf16>
    %c64 = arith.constant 64 : index
    %c0_45 = arith.constant 0 : index
    %89 = vector.load %arg7[%c64, %c0_45] : memref<128x128xbf16, #tpu.memory_space<vmem>>, vector<32x128xbf16>
    %cst_46 = arith.constant dense<0.000000e+00> : vector<8x128xf32>
    %90 = tpu.matmul %88, %89, %cst_46 {dimension_numbers = #tpu.dot_dimension_numbers<[1], [0], [0], [1], [0, 0, 1, 1], [], []>} : vector<8x32xbf16>, vector<32x128xbf16>, vector<8x128xf32> -> vector<8x128xf32>
    %91 = arith.addf %87, %90 : vector<8x128xf32>
    %c0_47 = arith.constant 0 : index
    %c0_48 = arith.constant 0 : index
    %92 = vector.load %arg10[%c0_47, %c0_48] : memref<16x128xf32, #tpu.memory_space<vmem>>, vector<8x128xf32>
    tpu.vector_store %arg10[%c0_47, %c0_48], %91 {strides = array<i32>} : memref<16x128xf32, #tpu.memory_space<vmem>>, vector<8x128xf32>,
    %93 = vector.extract_strided_slice %23 {offsets = [0, 96], sizes = [8, 32], strides = [1, 1]} : vector<8x128xbf16> to vector<8x32xbf16>
    %94 = vector.extract_strided_slice %25 {offsets = [96, 0], sizes = [32, 16], strides = [1, 1]} : vector<128x16xbf16> to vector<32x16xbf16>
    %cst_49 = arith.constant dense<0.000000e+00> : vector<8x16xf32>
    %95 = tpu.matmul %93, %94, %cst_49 {dimension_numbers = #tpu.dot_dimension_numbers<[1], [0], [0], [1], [0, 0, 1, 1], [], []>} : vector<8x32xbf16>, vector<32x16xbf16>, vector<8x16xf32> -> vector<8x16xf32>
    %cst_50 = arith.constant dense<0xFF800000> : vector<8xf32>
    %96 = vector.multi_reduction <maximumf>, %95, %cst_50 [1] : vector<8x16xf32> to vector<8xf32>
    %97 = vector.shape_cast %96 : vector<8xf32> to vector<8x1xf32>
    %98 = vector.broadcast %97 : vector<8x1xf32> to vector<8x16xf32>
    %99 = arith.subf %95, %98 : vector<8x16xf32>
    %100 = math.exp %99 : vector<8x16xf32>
    %cst_51 = arith.constant dense<0.000000e+00> : vector<8xf32>
    %101 = vector.multi_reduction <add>, %100, %cst_51 [1] : vector<8x16xf32> to vector<8xf32>
    %102 = vector.shape_cast %101 : vector<8xf32> to vector<8x1xf32>
    %103 = tpu.reciprocal %102 {approx = true} : vector<8x1xf32> -> vector<8x1xf32>
    %104 = vector.broadcast %103 : vector<8x1xf32> to vector<8x16xf32>
    %105 = arith.mulf %100, %104 : vector<8x16xf32>
    %106 = arith.truncf %105 : vector<8x16xf32> to vector<8x16xbf16>
    %107 = vector.extract_strided_slice %26 {offsets = [0, 96], sizes = [16, 32], strides = [1, 1]} : vector<16x128xbf16> to vector<16x32xbf16>
    %cst_52 = arith.constant dense<0.000000e+00> : vector<8x32xf32>
    %108 = tpu.matmul %106, %107, %cst_52 {dimension_numbers = #tpu.dot_dimension_numbers<[1], [0], [0], [1], [0, 0, 1, 1], [], []>} : vector<8x16xbf16>, vector<16x32xbf16>, vector<8x32xf32> -> vector<8x32xf32>
    %c0_53 = arith.constant 0 : index
    %c0_54 = arith.constant 0 : index
    %109 = vector.load %arg10[%c0_53, %c0_54] : memref<16x128xf32, #tpu.memory_space<vmem>>, vector<8x128xf32>
    %110 = arith.truncf %108 : vector<8x32xf32> to vector<8x32xbf16>
    %c96 = arith.constant 96 : index
    %c0_55 = arith.constant 0 : index
    %111 = vector.load %arg7[%c96, %c0_55] : memref<128x128xbf16, #tpu.memory_space<vmem>>, vector<32x128xbf16>
    %cst_56 = arith.constant dense<0.000000e+00> : vector<8x128xf32>
    %112 = tpu.matmul %110, %111, %cst_56 {dimension_numbers = #tpu.dot_dimension_numbers<[1], [0], [0], [1], [0, 0, 1, 1], [], []>} : vector<8x32xbf16>, vector<32x128xbf16>, vector<8x128xf32> -> vector<8x128xf32>
    %113 = arith.addf %109, %112 : vector<8x128xf32>
    %c0_57 = arith.constant 0 : index
    %c0_58 = arith.constant 0 : index
    %114 = vector.load %arg10[%c0_57, %c0_58] : memref<16x128xf32, #tpu.memory_space<vmem>>, vector<8x128xf32>
    tpu.vector_store %arg10[%c0_57, %c0_58], %113 {strides = array<i32>} : memref<16x128xf32, #tpu.memory_space<vmem>>, vector<8x128xf32>,
    %115 = vector.extract_strided_slice %11 {offsets = [8, 0], sizes = [8, 128], strides = [1, 1]} : vector<16x128xbf16> to vector<8x128xbf16>
    %116 = vector.extract_strided_slice %18 {offsets = [16, 0], sizes = [16, 128], strides = [1, 1]} : vector<32x128xbf16> to vector<16x128xbf16>
    %117 = tpu.transpose %116, [1, 0] : vector<16x128xbf16> -> vector<128x16xbf16>
    %118 = vector.extract_strided_slice %20 {offsets = [16, 0], sizes = [16, 128], strides = [1, 1]} : vector<32x128xbf16> to vector<16x128xbf16>
    %119 = vector.extract_strided_slice %115 {offsets = [0, 0], sizes = [8, 32], strides = [1, 1]} : vector<8x128xbf16> to vector<8x32xbf16>
    %120 = vector.extract_strided_slice %117 {offsets = [0, 0], sizes = [32, 16], strides = [1, 1]} : vector<128x16xbf16> to vector<32x16xbf16>
    %cst_59 = arith.constant dense<0.000000e+00> : vector<8x16xf32>
    %121 = tpu.matmul %119, %120, %cst_59 {dimension_numbers = #tpu.dot_dimension_numbers<[1], [0], [0], [1], [0, 0, 1, 1], [], []>} : vector<8x32xbf16>, vector<32x16xbf16>, vector<8x16xf32> -> vector<8x16xf32>
    %cst_60 = arith.constant dense<0xFF800000> : vector<8xf32>
    %122 = vector.multi_reduction <maximumf>, %121, %cst_60 [1] : vector<8x16xf32> to vector<8xf32>
    %123 = vector.shape_cast %122 : vector<8xf32> to vector<8x1xf32>
    %124 = vector.broadcast %123 : vector<8x1xf32> to vector<8x16xf32>
    %125 = arith.subf %121, %124 : vector<8x16xf32>
    %126 = math.exp %125 : vector<8x16xf32>
    %cst_61 = arith.constant dense<0.000000e+00> : vector<8xf32>
    %127 = vector.multi_reduction <add>, %126, %cst_61 [1] : vector<8x16xf32> to vector<8xf32>
    %128 = vector.shape_cast %127 : vector<8xf32> to vector<8x1xf32>
    %129 = tpu.reciprocal %128 {approx = true} : vector<8x1xf32> -> vector<8x1xf32>
    %130 = vector.broadcast %129 : vector<8x1xf32> to vector<8x16xf32>
    %131 = arith.mulf %126, %130 : vector<8x16xf32>
    %132 = arith.truncf %131 : vector<8x16xf32> to vector<8x16xbf16>
    %133 = vector.extract_strided_slice %118 {offsets = [0, 0], sizes = [16, 32], strides = [1, 1]} : vector<16x128xbf16> to vector<16x32xbf16>
    %cst_62 = arith.constant dense<0.000000e+00> : vector<8x32xf32>
    %134 = tpu.matmul %132, %133, %cst_62 {dimension_numbers = #tpu.dot_dimension_numbers<[1], [0], [0], [1], [0, 0, 1, 1], [], []>} : vector<8x16xbf16>, vector<16x32xbf16>, vector<8x32xf32> -> vector<8x32xf32>
    %c8 = arith.constant 8 : index
    %c0_63 = arith.constant 0 : index
    %135 = vector.load %arg10[%c8, %c0_63] : memref<16x128xf32, #tpu.memory_space<vmem>>, vector<8x128xf32>
    %136 = arith.truncf %134 : vector<8x32xf32> to vector<8x32xbf16>
    %c0_64 = arith.constant 0 : index
    %c0_65 = arith.constant 0 : index
    %137 = vector.load %arg7[%c0_64, %c0_65] : memref<128x128xbf16, #tpu.memory_space<vmem>>, vector<32x128xbf16>
    %cst_66 = arith.constant dense<0.000000e+00> : vector<8x128xf32>
    %138 = tpu.matmul %136, %137, %cst_66 {dimension_numbers = #tpu.dot_dimension_numbers<[1], [0], [0], [1], [0, 0, 1, 1], [], []>} : vector<8x32xbf16>, vector<32x128xbf16>, vector<8x128xf32> -> vector<8x128xf32>
    %139 = arith.addf %135, %138 : vector<8x128xf32>
    %c8_67 = arith.constant 8 : index
    %c0_68 = arith.constant 0 : index
    %140 = vector.load %arg10[%c8_67, %c0_68] : memref<16x128xf32, #tpu.memory_space<vmem>>, vector<8x128xf32>
    tpu.vector_store %arg10[%c8_67, %c0_68], %139 {strides = array<i32>} : memref<16x128xf32, #tpu.memory_space<vmem>>, vector<8x128xf32>,
    %141 = vector.extract_strided_slice %115 {offsets = [0, 32], sizes = [8, 32], strides = [1, 1]} : vector<8x128xbf16> to vector<8x32xbf16>
    %142 = vector.extract_strided_slice %117 {offsets = [32, 0], sizes = [32, 16], strides = [1, 1]} : vector<128x16xbf16> to vector<32x16xbf16>
    %cst_69 = arith.constant dense<0.000000e+00> : vector<8x16xf32>
    %143 = tpu.matmul %141, %142, %cst_69 {dimension_numbers = #tpu.dot_dimension_numbers<[1], [0], [0], [1], [0, 0, 1, 1], [], []>} : vector<8x32xbf16>, vector<32x16xbf16>, vector<8x16xf32> -> vector<8x16xf32>
    %cst_70 = arith.constant dense<0xFF800000> : vector<8xf32>
    %144 = vector.multi_reduction <maximumf>, %143, %cst_70 [1] : vector<8x16xf32> to vector<8xf32>
    %145 = vector.shape_cast %144 : vector<8xf32> to vector<8x1xf32>
    %146 = vector.broadcast %145 : vector<8x1xf32> to vector<8x16xf32>
    %147 = arith.subf %143, %146 : vector<8x16xf32>
    %148 = math.exp %147 : vector<8x16xf32>
    %cst_71 = arith.constant dense<0.000000e+00> : vector<8xf32>
    %149 = vector.multi_reduction <add>, %148, %cst_71 [1] : vector<8x16xf32> to vector<8xf32>
    %150 = vector.shape_cast %149 : vector<8xf32> to vector<8x1xf32>
    %151 = tpu.reciprocal %150 {approx = true} : vector<8x1xf32> -> vector<8x1xf32>
    %152 = vector.broadcast %151 : vector<8x1xf32> to vector<8x16xf32>
    %153 = arith.mulf %148, %152 : vector<8x16xf32>
    %154 = arith.truncf %153 : vector<8x16xf32> to vector<8x16xbf16>
    %155 = vector.extract_strided_slice %118 {offsets = [0, 32], sizes = [16, 32], strides = [1, 1]} : vector<16x128xbf16> to vector<16x32xbf16>
    %cst_72 = arith.constant dense<0.000000e+00> : vector<8x32xf32>
    %156 = tpu.matmul %154, %155, %cst_72 {dimension_numbers = #tpu.dot_dimension_numbers<[1], [0], [0], [1], [0, 0, 1, 1], [], []>} : vector<8x16xbf16>, vector<16x32xbf16>, vector<8x32xf32> -> vector<8x32xf32>
    %c8_73 = arith.constant 8 : index
    %c0_74 = arith.constant 0 : index
    %157 = vector.load %arg10[%c8_73, %c0_74] : memref<16x128xf32, #tpu.memory_space<vmem>>, vector<8x128xf32>
    %158 = arith.truncf %156 : vector<8x32xf32> to vector<8x32xbf16>
    %c32_75 = arith.constant 32 : index
    %c0_76 = arith.constant 0 : index
    %159 = vector.load %arg7[%c32_75, %c0_76] : memref<128x128xbf16, #tpu.memory_space<vmem>>, vector<32x128xbf16>
    %cst_77 = arith.constant dense<0.000000e+00> : vector<8x128xf32>
    %160 = tpu.matmul %158, %159, %cst_77 {dimension_numbers = #tpu.dot_dimension_numbers<[1], [0], [0], [1], [0, 0, 1, 1], [], []>} : vector<8x32xbf16>, vector<32x128xbf16>, vector<8x128xf32> -> vector<8x128xf32>
    %161 = arith.addf %157, %160 : vector<8x128xf32>
    %c8_78 = arith.constant 8 : index
    %c0_79 = arith.constant 0 : index
    %162 = vector.load %arg10[%c8_78, %c0_79] : memref<16x128xf32, #tpu.memory_space<vmem>>, vector<8x128xf32>
    tpu.vector_store %arg10[%c8_78, %c0_79], %161 {strides = array<i32>} : memref<16x128xf32, #tpu.memory_space<vmem>>, vector<8x128xf32>,
    %163 = vector.extract_strided_slice %115 {offsets = [0, 64], sizes = [8, 32], strides = [1, 1]} : vector<8x128xbf16> to vector<8x32xbf16>
    %164 = vector.extract_strided_slice %117 {offsets = [64, 0], sizes = [32, 16], strides = [1, 1]} : vector<128x16xbf16> to vector<32x16xbf16>
    %cst_80 = arith.constant dense<0.000000e+00> : vector<8x16xf32>
    %165 = tpu.matmul %163, %164, %cst_80 {dimension_numbers = #tpu.dot_dimension_numbers<[1], [0], [0], [1], [0, 0, 1, 1], [], []>} : vector<8x32xbf16>, vector<32x16xbf16>, vector<8x16xf32> -> vector<8x16xf32>
    %cst_81 = arith.constant dense<0xFF800000> : vector<8xf32>
    %166 = vector.multi_reduction <maximumf>, %165, %cst_81 [1] : vector<8x16xf32> to vector<8xf32>
    %167 = vector.shape_cast %166 : vector<8xf32> to vector<8x1xf32>
    %168 = vector.broadcast %167 : vector<8x1xf32> to vector<8x16xf32>
    %169 = arith.subf %165, %168 : vector<8x16xf32>
    %170 = math.exp %169 : vector<8x16xf32>
    %cst_82 = arith.constant dense<0.000000e+00> : vector<8xf32>
    %171 = vector.multi_reduction <add>, %170, %cst_82 [1] : vector<8x16xf32> to vector<8xf32>
    %172 = vector.shape_cast %171 : vector<8xf32> to vector<8x1xf32>
    %173 = tpu.reciprocal %172 {approx = true} : vector<8x1xf32> -> vector<8x1xf32>
    %174 = vector.broadcast %173 : vector<8x1xf32> to vector<8x16xf32>
    %175 = arith.mulf %170, %174 : vector<8x16xf32>
    %176 = arith.truncf %175 : vector<8x16xf32> to vector<8x16xbf16>
    %177 = vector.extract_strided_slice %118 {offsets = [0, 64], sizes = [16, 32], strides = [1, 1]} : vector<16x128xbf16> to vector<16x32xbf16>
    %cst_83 = arith.constant dense<0.000000e+00> : vector<8x32xf32>
    %178 = tpu.matmul %176, %177, %cst_83 {dimension_numbers = #tpu.dot_dimension_numbers<[1], [0], [0], [1], [0, 0, 1, 1], [], []>} : vector<8x16xbf16>, vector<16x32xbf16>, vector<8x32xf32> -> vector<8x32xf32>
    %c8_84 = arith.constant 8 : index
    %c0_85 = arith.constant 0 : index
    %179 = vector.load %arg10[%c8_84, %c0_85] : memref<16x128xf32, #tpu.memory_space<vmem>>, vector<8x128xf32>
    %180 = arith.truncf %178 : vector<8x32xf32> to vector<8x32xbf16>
    %c64_86 = arith.constant 64 : index
    %c0_87 = arith.constant 0 : index
    %181 = vector.load %arg7[%c64_86, %c0_87] : memref<128x128xbf16, #tpu.memory_space<vmem>>, vector<32x128xbf16>
    %cst_88 = arith.constant dense<0.000000e+00> : vector<8x128xf32>
    %182 = tpu.matmul %180, %181, %cst_88 {dimension_numbers = #tpu.dot_dimension_numbers<[1], [0], [0], [1], [0, 0, 1, 1], [], []>} : vector<8x32xbf16>, vector<32x128xbf16>, vector<8x128xf32> -> vector<8x128xf32>
    %183 = arith.addf %179, %182 : vector<8x128xf32>
    %c8_89 = arith.constant 8 : index
    %c0_90 = arith.constant 0 : index
    %184 = vector.load %arg10[%c8_89, %c0_90] : memref<16x128xf32, #tpu.memory_space<vmem>>, vector<8x128xf32>
    tpu.vector_store %arg10[%c8_89, %c0_90], %183 {strides = array<i32>} : memref<16x128xf32, #tpu.memory_space<vmem>>, vector<8x128xf32>,
    %185 = vector.extract_strided_slice %115 {offsets = [0, 96], sizes = [8, 32], strides = [1, 1]} : vector<8x128xbf16> to vector<8x32xbf16>
    %186 = vector.extract_strided_slice %117 {offsets = [96, 0], sizes = [32, 16], strides = [1, 1]} : vector<128x16xbf16> to vector<32x16xbf16>
    %cst_91 = arith.constant dense<0.000000e+00> : vector<8x16xf32>
    %187 = tpu.matmul %185, %186, %cst_91 {dimension_numbers = #tpu.dot_dimension_numbers<[1], [0], [0], [1], [0, 0, 1, 1], [], []>} : vector<8x32xbf16>, vector<32x16xbf16>, vector<8x16xf32> -> vector<8x16xf32>
    %cst_92 = arith.constant dense<0xFF800000> : vector<8xf32>
    %188 = vector.multi_reduction <maximumf>, %187, %cst_92 [1] : vector<8x16xf32> to vector<8xf32>
    %189 = vector.shape_cast %188 : vector<8xf32> to vector<8x1xf32>
    %190 = vector.broadcast %189 : vector<8x1xf32> to vector<8x16xf32>
    %191 = arith.subf %187, %190 : vector<8x16xf32>
    %192 = math.exp %191 : vector<8x16xf32>
    %cst_93 = arith.constant dense<0.000000e+00> : vector<8xf32>
    %193 = vector.multi_reduction <add>, %192, %cst_93 [1] : vector<8x16xf32> to vector<8xf32>
    %194 = vector.shape_cast %193 : vector<8xf32> to vector<8x1xf32>
    %195 = tpu.reciprocal %194 {approx = true} : vector<8x1xf32> -> vector<8x1xf32>
    %196 = vector.broadcast %195 : vector<8x1xf32> to vector<8x16xf32>
    %197 = arith.mulf %192, %196 : vector<8x16xf32>
    %198 = arith.truncf %197 : vector<8x16xf32> to vector<8x16xbf16>
    %199 = vector.extract_strided_slice %118 {offsets = [0, 96], sizes = [16, 32], strides = [1, 1]} : vector<16x128xbf16> to vector<16x32xbf16>
    %cst_94 = arith.constant dense<0.000000e+00> : vector<8x32xf32>
    %200 = tpu.matmul %198, %199, %cst_94 {dimension_numbers = #tpu.dot_dimension_numbers<[1], [0], [0], [1], [0, 0, 1, 1], [], []>} : vector<8x16xbf16>, vector<16x32xbf16>, vector<8x32xf32> -> vector<8x32xf32>
    %c8_95 = arith.constant 8 : index
    %c0_96 = arith.constant 0 : index
    %201 = vector.load %arg10[%c8_95, %c0_96] : memref<16x128xf32, #tpu.memory_space<vmem>>, vector<8x128xf32>
    %202 = arith.truncf %200 : vector<8x32xf32> to vector<8x32xbf16>
    %c96_97 = arith.constant 96 : index
    %c0_98 = arith.constant 0 : index
    %203 = vector.load %arg7[%c96_97, %c0_98] : memref<128x128xbf16, #tpu.memory_space<vmem>>, vector<32x128xbf16>
    %cst_99 = arith.constant dense<0.000000e+00> : vector<8x128xf32>
    %204 = tpu.matmul %202, %203, %cst_99 {dimension_numbers = #tpu.dot_dimension_numbers<[1], [0], [0], [1], [0, 0, 1, 1], [], []>} : vector<8x32xbf16>, vector<32x128xbf16>, vector<8x128xf32> -> vector<8x128xf32>
    %205 = arith.addf %201, %204 : vector<8x128xf32>
    %c8_100 = arith.constant 8 : index
    %c0_101 = arith.constant 0 : index
    %206 = vector.load %arg10[%c8_100, %c0_101] : memref<16x128xf32, #tpu.memory_space<vmem>>, vector<8x128xf32>
    tpu.vector_store %arg10[%c8_100, %c0_101], %205 {strides = array<i32>} : memref<16x128xf32, #tpu.memory_space<vmem>>, vector<8x128xf32>,
    %c0_102 = arith.constant 0 : index
    %c0_103 = arith.constant 0 : index
    %207 = vector.load %arg10[%c0_102, %c0_103] : memref<16x128xf32, #tpu.memory_space<vmem>>, vector<16x128xf32>
    %c0_104 = arith.constant 0 : index
    %c0_105 = arith.constant 0 : index
    %208 = vector.load %arg8[%c0_104, %c0_105] : memref<1x128xf32, #tpu.memory_space<vmem>>, vector<1x128xf32>
    %209 = vector.broadcast %208 : vector<1x128xf32> to vector<16x128xf32>
    %210 = arith.addf %207, %209 : vector<16x128xf32>
    %211 = vector.shape_cast %210 : vector<16x128xf32> to vector<2x8x128xf32>
    %c0_106 = arith.constant 0 : index
    %c0_107 = arith.constant 0 : index
    %c0_108 = arith.constant 0 : index
    %212 = vector.load %arg9[%c0_106, %c0_107, %c0_108] : memref<2x8x128xf32, #tpu.memory_space<vmem>>, vector<2x8x128xf32>
    tpu.vector_store %arg9[%c0_106, %c0_107, %c0_108], %211 {strides = array<i32>} : memref<2x8x128xf32, #tpu.memory_space<vmem>>, vector<2x8x128xf32>,
    return
  }
  func.func @transform_0(%arg0: i32) -> (i32, i32, i32) {
    %c0_i32 = arith.constant 0 : i32
    %c0_i32_0 = arith.constant 0 : i32
    %c0_i32_1 = arith.constant 0 : i32
    return %arg0, %c0_i32, %c0_i32_0 : i32, i32, i32
  }
  func.func @transform_1(%arg0: i32) -> (i32, i32, i32) {
    %c0_i32 = arith.constant 0 : i32
    %c0_i32_0 = arith.constant 0 : i32
    %c0_i32_1 = arith.constant 0 : i32
    return %arg0, %c0_i32, %c0_i32_0 : i32, i32, i32
  }
  func.func @transform_2(%arg0: i32) -> (i32, i32) {
    %c0_i32 = arith.constant 0 : i32
    %c0_i32_0 = arith.constant 0 : i32
    %c0_i32_1 = arith.constant 0 : i32
    return %c0_i32, %c0_i32_0 : i32, i32
  }
  func.func @transform_3(%arg0: i32) -> (i32, i32) {
    %c0_i32 = arith.constant 0 : i32
    %c0_i32_0 = arith.constant 0 : i32
    %c0_i32_1 = arith.constant 0 : i32
    return %c0_i32, %c0_i32_0 : i32, i32
  }
  func.func @transform_4(%arg0: i32) -> (i32, i32) {
    %c0_i32 = arith.constant 0 : i32
    %c0_i32_0 = arith.constant 0 : i32
    %c0_i32_1 = arith.constant 0 : i32
    return %c0_i32, %c0_i32_0 : i32, i32
  }
  func.func @transform_5(%arg0: i32) -> (i32, i32) {
    %c0_i32 = arith.constant 0 : i32
    %c0_i32_0 = arith.constant 0 : i32
    %c0_i32_1 = arith.constant 0 : i32
    return %c0_i32, %c0_i32_0 : i32, i32
  }
  func.func @transform_6(%arg0: i32) -> (i32, i32) {
    %c0_i32 = arith.constant 0 : i32
    %c0_i32_0 = arith.constant 0 : i32
    %c0_i32_1 = arith.constant 0 : i32
    return %c0_i32, %c0_i32_0 : i32, i32
  }
  func.func @transform_7(%arg0: i32) -> (i32, i32) {
    %c0_i32 = arith.constant 0 : i32
    %c0_i32_0 = arith.constant 0 : i32
    %c0_i32_1 = arith.constant 0 : i32
    return %c0_i32, %c0_i32_0 : i32, i32
  }
  func.func @transform_8(%arg0: i32) -> (i32, i32, i32) {
    %c0_i32 = arith.constant 0 : i32
    %c0_i32_0 = arith.constant 0 : i32
    %c0_i32_1 = arith.constant 0 : i32
    return %arg0, %c0_i32, %c0_i32_0 : i32, i32, i32
  }
}

</mosaic_0001>

<bundles_post_ra>
// kernel: tpu_custom_call.1
= control target key start
LH: loop header
LB: loop body
LE: loop exit
PB: predicated region body
PF: predicated region fallthrough
CT: control target
= control target key end

     0   :  { %13 = vsyncpa [#allocation4], 0  ;;  %s2600_s0 = inlined_call_operand.hbm [shape: bf16[2,8,128], index: 0, kind: input, shape index: {}]   ;;  %s2601_s1 = inlined_call_operand.hbm [shape: bf16[2,16,64], index: 1, kind: input, shape index: {}]   ;;  %s2602_s2 = inlined_call_operand.hbm [shape: bf16[128,128], index: 2, kind: input, shape index: {}]   ;;  %s2603_s3 = inlined_call_operand.vmem [shape: f32[1,128], index: 3, kind: input, shape index: {}]   ;;  %s2604_s4 = inlined_call_operand.hbm [shape: bf16[64,256], index: 4, kind: input, shape index: {}]   ;;  %s2605_s5 = inlined_call_operand.vmem [shape: f32[1,256], index: 5, kind: input, shape index: {}]   ;;  %s2606_s6 = inlined_call_operand.hbm [shape: bf16[128,128], index: 6, kind: input, shape index: {}]   ;;  %s2607_s7 = inlined_call_operand.vmem [shape: f32[1,128], index: 7, kind: input, shape index: {}]   ;;  %s2608_s8 = inlined_call_operand.hbm [shape: f32[2,8,128], index: 8, kind: output, shape index: {}]  }
   0x1   :  { %14 = vsyncpa [#allocation7], 0 }
   0x2   :  { %15 = vsyncpa [#allocation10], 0 }
   0x3   :  { %16 = vsyncpa [#allocation5], 0  ;;  %s2278_s27 = smov [#allocation6]   ;;  %s2279_s29 = smov [#allocation9]  }
   0x4   :  { %s34_s28 = sshll.u32 %s2278_s27, 4  ;;  %s60_s30 = sshll.u32 %s2279_s29, 4  ;;  %s35_s28 = int_to_ptr.vmem [resolvable:$true] %s34_s28  ;;  %s61_s30 = int_to_ptr.vmem [resolvable:$true] %s60_s30 }
   0x5   :  { %s2158_s9 = scalar_lea.vmem %s35_s28, 256  ;;  %p2163_p1 = scmp.lt.s32.totalorder %s35_s28, %s35_s28 }
   0x6   :  { %p2159_p0 = scmp.ne.s32.totalorder %s35_s28, %s2158_s9  ;;  %p2164_p2 = scmp.lt.s32.totalorder %s2158_s9, %s2158_s9 }
   0x8   :  { %p2165_p3 = por %p2164_p2, %p2163_p1 }
   0xa   :  { %p2166_p4 = pnand %p2165_p3, %p2159_p0 }
   0xc   :  { %2169 = shalt.err (!%p2166_p4)
}
   0xd   :  { %s2280_s10 = smov 64   ;;  %s2281_s11 = smov 4  }
   0xe   :  { %40 = dma.hbm_to_vmem [thread:$0]  %s2601_s1, 256, %s35_s28, [#allocation7], %s2280_s10, %s2280_s10, %s2281_s11  }
   0xf   :  { %s2178_s14 = scalar_lea.vmem %s61_s30, 1024  ;;  %p2183_p6 = scmp.lt.s32.totalorder %s61_s30, %s61_s30 }
  0x10   :  { %p2179_p5 = scmp.ne.s32.totalorder %s61_s30, %s2178_s14  ;;  %p2184_p7 = scmp.lt.s32.totalorder %s2178_s14, %s2178_s14 }
  0x12   :  { %p2185_p8 = por %p2184_p7, %p2183_p6 }
  0x14   :  { %p2186_p9 = pnand %p2185_p8, %p2179_p5 }
  0x16   :  { %2189 = shalt.err (!%p2186_p9)
}
  0x17   :  { %s2282_s15 = smov 128   ;;  %s2283_s16 = smov 8  }
  0x18   :  { %66 = dma.hbm_to_vmem [thread:$0]  %s2604_s4, 1024, %s61_s30, [#allocation10], %s2282_s15, %s2282_s15, %s2283_s16  }
  0x19   :  { %s2284_s19 = smov [#allocation3]   ;;  %s2285_s21 = smov [#allocation8]  }
  0x1a   :  { %s22_s20 = sshll.u32 %s2284_s19, 4  ;;  %s46_s1 = sshll.u32 %s2285_s21, 4  ;;  %s23_s20 = int_to_ptr.vmem [resolvable:$true] %s22_s20  ;;  %s47_s1 = int_to_ptr.vmem [resolvable:$true] %s46_s1 }
  0x1b   :  { %s2198_s22 = scalar_lea.vmem %s23_s20, 128  ;;  %p2203_p11 = scmp.lt.s32.totalorder %s23_s20, %s23_s20 }
  0x1c   :  { %p2199_p10 = scmp.ne.s32.totalorder %s23_s20, %s2198_s22  ;;  %p2204_p12 = scmp.lt.s32.totalorder %s2198_s22, %s2198_s22 }
  0x1e   :  { %p2205_p13 = por %p2204_p12, %p2203_p11 }
  0x20   :  { %p2206_p0 = pnand %p2205_p13, %p2199_p10 }
  0x22   :  { %2209 = shalt.err (!%p2206_p0)
}
  0x23   :  { %28 = dma.hbm_to_vmem [thread:$0]  %s2600_s0, 128, %s23_s20, [#allocation4], %s2280_s10, %s2280_s10, %s2281_s11  }
  0x24   :  { %s2218_s4 = scalar_lea.vmem %s47_s1, 1024  ;;  %p2223_p2 = scmp.lt.s32.totalorder %s47_s1, %s47_s1 }
  0x25   :  { %p2219_p1 = scmp.ne.s32.totalorder %s47_s1, %s2218_s4  ;;  %p2224_p3 = scmp.lt.s32.totalorder %s2218_s4, %s2218_s4 }
  0x27   :  { %p2225_p4 = por %p2224_p3, %p2223_p2 }
  0x29   :  { %p2226_p5 = pnand %p2225_p4, %p2219_p1 }
  0x2b   :  { %2229 = shalt.err (!%p2226_p5)
}
  0x2c   :  { %52 = dma.hbm_to_vmem [thread:$0]  %s2602_s2, 1024, %s47_s1, [#allocation7], %s2280_s10, %s2280_s10, %s2281_s11  }
  0x2d   :  { %s2286_s27 = smov [#allocation11]  }
  0x2e   :  { %s74_s28 = sshll.u32 %s2286_s27, 4  ;;  %s75_s28 = int_to_ptr.vmem [resolvable:$true] %s74_s28 }
  0x2f   :  { %s2238_s29 = scalar_lea.vmem %s75_s28, 1024  ;;  %p2243_p7 = scmp.lt.s32.totalorder %s75_s28, %s75_s28 }
  0x30   :  { %p2239_p6 = scmp.ne.s32.totalorder %s75_s28, %s2238_s29  ;;  %p2244_p8 = scmp.lt.s32.totalorder %s2238_s29, %s2238_s29 }
  0x32   :  { %p2245_p9 = por %p2244_p8, %p2243_p7 }
  0x34   :  { %p2246_p10 = pnand %p2245_p9, %p2239_p6 }
  0x36   :  { %2249 = shalt.err (!%p2246_p10)
}
  0x37   :  { %80 = dma.hbm_to_vmem [thread:$0]  %s2606_s6, 1024, %s75_s28, [#allocation10], %s2280_s10, %s2280_s10, %s2281_s11  }
  0x38   :  { %2270 = dma.done.wait [#allocation4], 128  }
  0x39   :  { %2271 = vsyncadd [#allocation4], 4294967168 }
  0x3a   :  { %2272 = dma.done.wait [#allocation7], 1280  }
  0x3b   :  { %2273 = vsyncadd [#allocation7], 4294966016 }
  0x3c   :  { %2274 = dma.done.wait [#allocation10], 2048  }
  0x3d   :  { %2275 = vsyncadd [#allocation10], 4294965248  ;;  %v2287_v0 = vmov 0.0   ;;  %v2288_v1 = vmov 0   ;;  %vm2289_vm0 = vmmov 0   ;;  %v2079_v2 = vld [vmem:[#allocation8 + $0x38] sm:$0xff]   ;;  %v236_v21 = vlaneseq }
  0x3e   :  { %1884 = vmatprep.subr.bf16.mxu0 %v2287_v0  ;;  %335 = vmatprep.mubr.bf16.mxu1 %v2288_v1  ;;  %v2080_v3 = vld [vmem:[#allocation9 + $0x34] ss:$8 sps:$4 sm:$0xff]   ;;  %v2082_v4 = vld [vmem:[#allocation9 + $0x30] ss:$8 sps:$4 sm:$0xff]   ;;  %v2084_v6 = vld [vmem:[#allocation9 + $0x24] ss:$8 sps:$4 sm:$0xff]  }
  0x3f   :  { %1900 = vmatprep.mubr.msk.bf16.mxu0 %vm2289_vm0, %v2287_v0  ;;  %1885 = vmatpush3.bf16.msra.mxu0 %v2079_v2  ;;  %v2083_v5 = vld [vmem:[#allocation8 + $0x30] sm:$0xff]   ;;  %v2086_v7 = vld [vmem:[#allocation9 + $0x20] ss:$8 sps:$4 sm:$0xff]   ;;  %v2092_v11 = vld [vmem:[#allocation9 + $0x4] ss:$8 sps:$4 sm:$0xff]   ;;  %vm296_vm1 = vcmask 523264  }
  0x40   :  { %311 = vmatprep.subr.bf16.mxu1 %v2080_v3  ;;  %1886 = vmatprep.subr.bf16.mxu0 %v2287_v0  ;;  %v2087_v8 = vld [vmem:[#allocation8 + $0x28] sm:$0xff]   ;;  %v2088_v9 = vld [vmem:[#allocation9 + $0x14] ss:$8 sps:$4 sm:$0xff]   ;;  %v2090_v10 = vld [vmem:[#allocation9 + $0x10] ss:$8 sps:$4 sm:$0xff]   ;;  %v237_v22 = vshrl.u32 %v236_v21, 7 }
  0x41   :  { %312 = vmatpush1.bf16.msra.mxu1 %v2082_v4  ;;  %v2091_v12 = vld [vmem:[#allocation8 + $0x20] sm:$0xff]   ;;  %v2095_v14 = vld [vmem:[#allocation8 + $0x18] sm:$0xff]   ;;  %v2096_v15 = vld [vmem:[#allocation6] sm:$0xff]   ;;  %vm362_vm2 = vcmask 261120   ;;  %vm409_vm3 = vcmask 130048  }
  0x42   :  { %313 = vmatprep.subr.bf16.mxu1 %v2084_v6  ;;  %v2094_v13 = vld [vmem:[#allocation9] ss:$8 sps:$4 sm:$0xff]   ;;  %v2097_v16 = vld [vmem:[#allocation8 + $0x10] sm:$0xff]   ;;  %v2101_v20 = vld [vmem:[#allocation6 + $0x8] sm:$0xff]   ;;  %v238_v23 = vsub.s32 0, %v237_v22  ;;  %v242_v25 = vsub.s32 1, %v237_v22 }
  0x43   :  { %1887 = vmatpush3.bf16.msra.mxu0 %v2083_v5  ;;  %v2098_v17 = vld [vmem:[#allocation8 + $0x8] sm:$0xff]   ;;  %v2099_v18 = vld [vmem:[#allocation8] sm:$0xff]  }
  0x44   :  { %1888 = vmatprep.subr.bf16.mxu0 %v2287_v0  ;;  %v2100_v19 = vld [vmem:[#allocation3] sm:$0xff]  }
  0x45   :  { %314 = vmatpush1.bf16.msra.mxu1 %v2086_v7  ;;  %v234_v24 = vld [vmem:[%s2605_s5] sm:$0x3]  ;;  %s2290_s5 = smov 96  }
  0x46   :  { %315 = vmatprep.subr.bf16.mxu1 %v2088_v9  ;;  %v239_v26 = vrot.slane %v234_v24, %v238_v23  ;;  %v2389_v28 = vrot.slane %v234_v24, %v242_v25  ;;  %v1756_v39 = vld [vmem:[%s2603_s3] ss:$0 sm:$0xff]  ;;  %s2291_s3 = smov 32  }
  0x47   :  { %1889 = vmatpush3.bf16.msra.mxu0 %v2087_v8  ;;  %v2102_v3 = vld [vmem:[#allocation11 + $0x8] sm:$0xff]  }
  0x48   :  { %1890 = vmatprep.subr.bf16.mxu0 %v2287_v0 }
  0x49   :  { %316 = vmatpush1.bf16.msra.mxu1 %v2090_v10 }
  0x4a   :  { %317 = vmatprep.subr.bf16.mxu1 %v2092_v11  ;;  %v2103_v11 = vld [vmem:[#allocation11] sm:$0xff]  }
  0x4b   :  { %1891 = vmatpush3.bf16.msra.mxu0 %v2091_v12 }
  0x4c   :  { %1892 = vmatprep.subr.bf16.mxu0 %v2287_v0 }
  0x4d   :  { %318 = vmatpush1.bf16.msra.mxu1 %v2094_v13 }
  0x4e   :  { %1904 = vmatprep.subr.bf16.mxu1 %v2287_v0 }
  0x4f   :  { %1893 = vmatpush3.bf16.msra.mxu0 %v2095_v14 }
  0x50   :  { %1776 = vmatmul.mubr.msk.bf16.vlgmr.msra.gmra.mxu1 %vm296_vm1, %v2096_v15  ;;  %1894 = vmatprep.subr.bf16.mxu0 %v2287_v0 }
  0x51   :  { %345 = vmatprep.mubr.bf16.mxu1 %v2288_v1 }
  0x53   :  { %1895 = vmatpush3.bf16.msra.mxu0 %v2097_v16 }
  0x54   :  { %1896 = vmatprep.subr.bf16.mxu0 %v2287_v0 }
  0x57   :  { %1897 = vmatpush3.bf16.msra.mxu0 %v2098_v17 }
  0x58   :  { %1898 = vmatprep.subr.bf16.mxu0 %v2287_v0  ;;  %1777 = vmatmul.mubr.msk.bf16.gmra.mxu1 %vm296_vm1, %v2101_v20 }
  0x59   :  { %1906 = vmatprep.mubr.msk.bf16.mxu1 %vm2289_vm0, %v2287_v0 }
  0x5b   :  { %1899 = vmatpush3.bf16.msra.mxu0 %v2099_v18 }
  0x5c   :  { %1910 = vmatprep.subr.bf16.mxu0 %v2287_v0 }
  0x5e   :  { %1901 = vmatmul.mubr.bf16.vlgmr.msra.gmra.mxu0 %v2100_v19 }
  0x5f   :  { %1912 = vmatprep.mubr.msk.bf16.mxu0 %vm2289_vm0, %v2287_v0 }
 0x110   :  { %v337_v27 = vpop.f32.mrf.mxu1 }
 0x111   :  { %v338_v30 = vadd.f32 %v337_v27, %v239_v26 }
 0x112   :  { %v339_v29 = vpop.f32.mrf.mxu1 }
 0x113   :  { %v340_v32 = vadd.f32 %v339_v29, %v2389_v28 }
 0x114   :  { %v341_v31 = vpop.f32.mrf.mxu1 }
 0x115   :  { %v342_v33 = vadd.f32 %v341_v31, %v239_v26 }
 0x116   :  { %v343_v34 = vpop.f32.mrf.mxu1 }
 0x117   :  { %v2392_v35 = vpack.c.bf16 %v342_v33, %v338_v30  ;;  %v344_v36 = vadd.f32 %v343_v34, %v2389_v28  ;;  %v2104_v33 = vld [vmem:[#allocation11 + $0x18] sm:$0xff]   ;;  %v2105_v34 = vld [vmem:[#allocation11 + $0x10] sm:$0xff]  }
 0x118   :  { %v347_v49 = vpop.f32.mrf.mxu1 }
 0x119   :  { %v2395_v37 = vpack.c.bf16 %v344_v36, %v340_v32  ;;  %532 = vrot.lane.b32.xlu1 %v2392_v35, %s2290_s5  ;;  %v367_v38 = vsel %vm362_vm2, %v2392_v35, 0  ;;  %v348_v51 = vadd.f32 %v347_v49, %v239_v26 }
 0x11a   :  { %1905 = vmatpush3.bf16.xpose.msra.mxu1 %v367_v38  ;;  %v2415_v50 = vpop.f32.mrf.mxu1 }
 0x11b   :  { %1911 = vmatpush3.bf16.msra.mxu0 %v2395_v37  ;;  %1916 = vmatprep.subr.bf16.mxu1 %v2287_v0 }
 0x11c   :  { %1924 = vmatprep.subr.bf16.mxu0 %v2287_v0  ;;  %v351_v52 = vpop.f32.mrf.mxu1 }
 0x11d   :  { %v352_v53 = vadd.f32 %v351_v52, %v239_v26 }
 0x11e   :  { %v216_v40 = vpop.f32.mrf.mxu0  ;;  %v2419_v55 = vpop.f32.mrf.mxu1 }
 0x11f   :  { %v217_v42 = vadd.f32 %v1756_v39, %v216_v40  ;;  %v2417_v54 = vpack.c.bf16 %v352_v53, %v348_v51 }
 0x120   :  { %v1902_v41 = vpop.f32.mrf.mxu0 }
 0x121   :  { %v223_v46 = vmul.f32 0.17677669, %v217_v42 }
 0x122   :  { %v219_v43 = vpop.f32.mrf.mxu0 }
 0x123   :  { %v220_v44 = vadd.f32 %v1756_v39, %v219_v43 }
 0x124   :  { %v1903_v45 = vpop.f32.mrf.mxu0 }
 0x125   :  { %v224_v47 = vmul.f32 0.17677669, %v220_v44 }
 0x127   :  { %v2407_v48 = vpack.c.bf16 %v224_v47, %v223_v46 }
 0x129   :  { %529 = vrot.lane.b32.xlu1 %v2407_v48, %s2290_s5  ;;  %1907 = vmatmul.mubr.msk.bf16.vlgmr.msra.gmra.mxu1 %vm362_vm2, %v2407_v48 }
 0x12a   :  { %1920 = vmatprep.mubr.msk.bf16.mxu1 %vm2289_vm0, %v2287_v0  ;;  %1917 = vmatpush3.bf16.msra.mxu1 %v2102_v3 }
 0x12b   :  { %1918 = vmatprep.subr.bf16.mxu1 %v2287_v0 }
 0x12e   :  { %1919 = vmatpush3.bf16.msra.mxu1 %v2103_v11 }
 0x12f   :  { %1930 = vmatprep.subr.bf16.mxu1 %v2287_v0 }
 0x18b   :  { %v533_v7 = vpop.permute.xlu1 %532 }
 0x18c   :  { %v538_v9 = vsel %vm362_vm2, %v533_v7, 0 }
 0x19b   :  { %v530_v10 = vpop.permute.xlu1 %529 }
 0x1e9   :  { %v403_v56 = vpop.f32.mrf.mxu1 }
 0x1ea   :  { %v410_v57 = vsel %vm409_vm3, %v403_v56, -inf }
 0x1eb   :  { %411 = vmax.xlane.f32.xlu0 %v410_v57  ;;  %v1908_v58 = vpop.f32.mrf.mxu1 }
 0x1ed   :  { %v406_v59 = vpop.f32.mrf.mxu1 }
 0x1ef   :  { %v1909_v60 = vpop.f32.mrf.mxu1 }
 0x274   :  { %v412_v61 = vpop.xlane.xlu0 %411 }
 0x275   :  { %v413_v62 = vsub.f32 %v403_v56, %v412_v61 }
 0x277   :  { %v414_v63 = vmul.f32 1.442695, %v413_v62 }
 0x279   :  { %2118 = vpow2.f32 %v414_v63 }
 0x286   :  { %v2119_v1 = vpop.eup %2118 }
 0x287   :  { %v416_v2 = vsel %vm409_vm3, %v2119_v1, 0.0 }
 0x288   :  { %417 = vadd.xlane.f32.xlu0 %v416_v2 }
 0x311   :  { %v418_v4 = vpop.xlane.xlu0 %417 }
 0x312   :  { %2120 = vrcp.f32 %v418_v4 }
 0x31f   :  { %v2121_v5 = vpop.eup %2120 }
 0x320   :  { %v420_v6 = vmul.f32 %v2121_v5, %v2119_v1  ;;  %v2106_v5 = vld [vmem:[#allocation11 + $0x28] sm:$0xff]  }
 0x322   :  { %v421_v8 = vpack.c.bf16 %v420_v6, %v420_v6 }
 0x324   :  { %1913 = vmatmul.mubr.msk.bf16.vlgmr.msra.gmra.mxu0 %vm409_vm3, %v421_v8 }
 0x325   :  { %1925 = vmatpush3.bf16.xpose.msra.mxu0 %v538_v9  ;;  %1926 = vmatprep.mubr.msk.bf16.mxu0 %vm2289_vm0, %v2287_v0 }
 0x326   :  { %1936 = vmatprep.subr.bf16.mxu0 %v2287_v0 }
 0x32c   :  { %1927 = vmatmul.mubr.msk.bf16.vlgmr.msra.gmra.mxu0 %vm362_vm2, %v530_v10 }
 0x32d   :  { %1940 = vmatprep.mubr.msk.bf16.mxu0 %vm2289_vm0, %v2287_v0  ;;  %1937 = vmatpush3.bf16.msra.mxu0 %v2104_v33 }
 0x32e   :  { %1938 = vmatprep.subr.bf16.mxu0 %v2287_v0 }
 0x331   :  { %1939 = vmatpush3.bf16.msra.mxu0 %v2105_v34 }
 0x332   :  { %1950 = vmatprep.subr.bf16.mxu0 %v2287_v0 }
 0x3e4   :  { %v459_v12 = vpop.f32.mrf.mxu0 }
 0x3e5   :  { %v466_v13 = vpack.c.bf16 %v459_v12, %v459_v12  ;;  %v2107_v12 = vld [vmem:[#allocation11 + $0x20] sm:$0xff]  }
 0x3e6   :  { %v1914_v14 = vpop.f32.mrf.mxu0 }
 0x3e7   :  { %1921 = vmatmul.mubr.msk.bf16.vlgmr.msra.gmra.mxu1 %vm362_vm2, %v466_v13 }
 0x3e8   :  { %v462_v15 = vpop.f32.mrf.mxu0  ;;  %1932 = vmatprep.mubr.msk.bf16.mxu1 %vm2289_vm0, %v2287_v0 }
 0x3ea   :  { %v1915_v16 = vpop.f32.mrf.mxu0 }
 0x3ec   :  { %v574_v17 = vpop.f32.mrf.mxu0 }
 0x3ed   :  { %v580_v18 = vsel %vm409_vm3, %v574_v17, -inf }
 0x3ee   :  { %581 = vmax.xlane.f32.xlu0 %v580_v18  ;;  %v1928_v19 = vpop.f32.mrf.mxu0 }
 0x3f0   :  { %v577_v20 = vpop.f32.mrf.mxu0 }
 0x3f2   :  { %v1929_v21 = vpop.f32.mrf.mxu0 }
 0x404   :  { %593 = vrot.lane.b32.xlu0 %v2395_v37, %s2290_s5 }
 0x408   :  { %704 = vrot.lane.b32.xlu0 %v2392_v35, %s2280_s10 }
 0x40c   :  { %702 = vrot.lane.b32.xlu0 %v2407_v48, %s2280_s10 }
 0x477   :  { %v582_v22 = vpop.xlane.xlu0 %581 }
 0x478   :  { %v583_v23 = vsub.f32 %v574_v17, %v582_v22 }
 0x47a   :  { %v584_v24 = vmul.f32 1.442695, %v583_v23 }
 0x47b   :  { %v594_v25 = vpop.permute.xlu0 %593 }
 0x47c   :  { %2122 = vpow2.f32 %v584_v24  ;;  %1931 = vmatpush3.bf16.msra.mxu1 %v594_v25 }
 0x47d   :  { %1944 = vmatprep.subr.bf16.mxu1 %v2287_v0 }
 0x47f   :  { %v705_v40 = vpop.permute.xlu0 %704 }
 0x480   :  { %v710_v42 = vsel %vm362_vm2, %v705_v40, 0 }
 0x483   :  { %v703_v43 = vpop.permute.xlu0 %702 }
 0x489   :  { %v2123_v26 = vpop.eup %2122 }
 0x48a   :  { %v586_v27 = vsel %vm409_vm3, %v2123_v26, 0.0 }
 0x48b   :  { %587 = vadd.xlane.f32.xlu1 %v586_v27 }
 0x49c   :  { %764 = vrot.lane.b32.xlu1 %v2395_v37, %s2280_s10 }
 0x4a7   :  { %v2447_v29 = vpop.f32.mrf.mxu1 }
 0x4a9   :  { %v1922_v30 = vpop.f32.mrf.mxu1 }
 0x4ab   :  { %v523_v31 = vpop.f32.mrf.mxu1 }
 0x4ad   :  { %v1923_v32 = vpop.f32.mrf.mxu1 }
 0x514   :  { %v588_v36 = vpop.xlane.xlu1 %587 }
 0x515   :  { %2124 = vrcp.f32 %v588_v36 }
 0x518   :  { %v765_v47 = vpop.permute.xlu1 %764 }
 0x522   :  { %v2125_v38 = vpop.eup %2124 }
 0x523   :  { %v590_v39 = vmul.f32 %v2125_v38, %v2123_v26 }
 0x525   :  { %v591_v41 = vpack.c.bf16 %v590_v39, %v590_v39  ;;  %v2109_v39 = vld [vmem:[#allocation11 + $0x30] sm:$0xff]  }
 0x527   :  { %1933 = vmatmul.mubr.msk.bf16.vlgmr.msra.gmra.mxu1 %vm409_vm3, %v591_v41 }
 0x528   :  { %1945 = vmatpush3.bf16.xpose.msra.mxu1 %v710_v42  ;;  %1946 = vmatprep.mubr.msk.bf16.mxu1 %vm2289_vm0, %v2287_v0 }
 0x529   :  { %1956 = vmatprep.subr.bf16.mxu1 %v2287_v0 }
 0x52f   :  { %1947 = vmatmul.mubr.msk.bf16.vlgmr.msra.gmra.mxu1 %vm362_vm2, %v703_v43 }
 0x530   :  { %1960 = vmatprep.mubr.msk.bf16.mxu1 %vm2289_vm0, %v2287_v0  ;;  %1957 = vmatpush3.bf16.msra.mxu1 %v2106_v5 }
 0x531   :  { %1958 = vmatprep.subr.bf16.mxu1 %v2287_v0 }
 0x534   :  { %1959 = vmatpush3.bf16.msra.mxu1 %v2107_v12 }
 0x535   :  { %1970 = vmatprep.subr.bf16.mxu1 %v2287_v0 }
 0x5e7   :  { %v633_v44 = vpop.f32.mrf.mxu1 }
 0x5e8   :  { %v640_v45 = vpack.c.bf16 %v633_v44, %v633_v44  ;;  %v2497_v44 = vrot.slane %v2407_v48, 4 }
 0x5e9   :  { %v1934_v46 = vpop.f32.mrf.mxu1 }
 0x5ea   :  { %1941 = vmatmul.mubr.msk.bf16.vlgmr.msra.gmra.mxu0 %vm362_vm2, %v640_v45  ;;  %v350_v45 = vadd.f32 %v2415_v50, %v2389_v28  ;;  %v354_v46 = vadd.f32 %v2419_v55, %v2389_v28 }
 0x5eb   :  { %1951 = vmatpush3.bf16.msra.mxu0 %v765_v47  ;;  %v636_v49 = vpop.f32.mrf.mxu1  ;;  %1952 = vmatprep.mubr.msk.bf16.mxu0 %vm2289_vm0, %v2287_v0 }
 0x5ec   :  { %1964 = vmatprep.subr.bf16.mxu0 %v2287_v0 }
 0x5ed   :  { %v1935_v51 = vpop.f32.mrf.mxu1 }
 0x5ee   :  { %v2507_v51 = vpack.c.bf16 %v354_v46, %v350_v45  ;;  %v2113_v46 = vld [vmem:[#allocation11 + $0x10] sm:$0xff]  }
 0x5ef   :  { %v746_v52 = vpop.f32.mrf.mxu1 }
 0x5f0   :  { %v752_v53 = vsel %vm409_vm3, %v746_v52, -inf }
 0x5f1   :  { %753 = vmax.xlane.f32.xlu0 %v752_v53  ;;  %v1948_v56 = vpop.f32.mrf.mxu1 }
 0x5f3   :  { %v749_v57 = vpop.f32.mrf.mxu1 }
 0x5f5   :  { %v1949_v58 = vpop.f32.mrf.mxu1 }
 0x67a   :  { %v754_v59 = vpop.xlane.xlu0 %753 }
 0x67b   :  { %v755_v60 = vsub.f32 %v746_v52, %v754_v59 }
 0x67d   :  { %v756_v61 = vmul.f32 1.442695, %v755_v60 }
 0x67f   :  { %2126 = vpow2.f32 %v756_v61 }
 0x68c   :  { %v2127_v62 = vpop.eup %2126 }
 0x68d   :  { %v758_v63 = vsel %vm409_vm3, %v2127_v62, 0.0 }
 0x68e   :  { %759 = vadd.xlane.f32.xlu1 %v758_v63 }
 0x69f   :  { %875 = vrot.lane.b32.xlu1 %v2392_v35, %s2291_s3 }
 0x6a3   :  { %873 = vrot.lane.b32.xlu1 %v2407_v48, %s2291_s3 }
 0x6aa   :  { %v694_v1 = vpop.f32.mrf.mxu0 }
 0x6ab   :  { %v700_v31 = vadd.f32 %v694_v1, %v2447_v29  ;;  %v1049_v29 = vsel %vm362_vm2, %v2417_v54, 0  ;;  %v2523_v1 = vld [vmem:[%s2607_s7] ss:$0 sm:$0xff]  ;;  %s2292_s7 = smov [#allocation12]  }
 0x6ac   :  { %v1942_v2 = vpop.f32.mrf.mxu0 }
 0x6ae   :  { %v697_v3 = vpop.f32.mrf.mxu0 }
 0x6b0   :  { %v1943_v4 = vpop.f32.mrf.mxu0 }
 0x717   :  { %v760_v6 = vpop.xlane.xlu1 %759 }
 0x718   :  { %2128 = vrcp.f32 %v760_v6 }
 0x71b   :  { %v876_v9 = vpop.permute.xlu1 %875 }
 0x71c   :  { %v881_v11 = vsel %vm362_vm2, %v876_v9, 0 }
 0x71f   :  { %v874_v35 = vpop.permute.xlu1 %873 }
 0x725   :  { %v2129_v7 = vpop.eup %2128 }
 0x726   :  { %v762_v8 = vmul.f32 %v2129_v7, %v2127_v62  ;;  %v2110_v7 = vld [vmem:[#allocation11 + $0x8] sm:$0xff]  }
 0x728   :  { %v763_v10 = vpack.c.bf16 %v762_v8, %v762_v8 }
 0x72a   :  { %1953 = vmatmul.mubr.msk.bf16.vlgmr.msra.gmra.mxu0 %vm409_vm3, %v763_v10 }
 0x72b   :  { %1965 = vmatpush3.bf16.xpose.msra.mxu0 %v881_v11  ;;  %1966 = vmatprep.mubr.msk.bf16.mxu0 %vm2289_vm0, %v2287_v0 }
 0x72c   :  { %1976 = vmatprep.subr.bf16.mxu0 %v2287_v0 }
 0x732   :  { %1967 = vmatmul.mubr.msk.bf16.vlgmr.msra.gmra.mxu0 %vm362_vm2, %v874_v35 }
 0x733   :  { %1980 = vmatprep.mubr.msk.bf16.mxu0 %vm2289_vm0, %v2287_v0 }
 0x7ea   :  { %v804_v13 = vpop.f32.mrf.mxu0 }
 0x7eb   :  { %v811_v14 = vpack.c.bf16 %v804_v13, %v804_v13 }
 0x7ec   :  { %v1954_v15 = vpop.f32.mrf.mxu0 }
 0x7ed   :  { %1961 = vmatmul.mubr.msk.bf16.vlgmr.msra.gmra.mxu1 %vm362_vm2, %v811_v14  ;;  %v2111_v14 = vld [vmem:[#allocation11] sm:$0xff]  }
 0x7ee   :  { %v807_v16 = vpop.f32.mrf.mxu0  ;;  %1972 = vmatprep.mubr.msk.bf16.mxu1 %vm2289_vm0, %v2287_v0 }
 0x7f0   :  { %v1955_v17 = vpop.f32.mrf.mxu0 }
 0x7f2   :  { %v917_v18 = vpop.f32.mrf.mxu0 }
 0x7f3   :  { %v923_v19 = vsel %vm409_vm3, %v917_v18, -inf }
 0x7f4   :  { %924 = vmax.xlane.f32.xlu0 %v923_v19  ;;  %v1968_v20 = vpop.f32.mrf.mxu0 }
 0x7f6   :  { %v920_v21 = vpop.f32.mrf.mxu0 }
 0x7f8   :  { %v1969_v22 = vpop.f32.mrf.mxu0 }
 0x80a   :  { %935 = vrot.lane.b32.xlu0 %v2395_v37, %s2291_s3  ;;  %v2108_v37 = vld [vmem:[#allocation11 + $0x38] sm:$0xff]  }
 0x80b   :  { %1977 = vmatpush3.bf16.msra.mxu0 %v2108_v37  ;;  %v2112_v37 = vld [vmem:[#allocation11 + $0x18] sm:$0xff]  }
 0x80c   :  { %1978 = vmatprep.subr.bf16.mxu0 %v2287_v0 }
 0x80f   :  { %1979 = vmatpush3.bf16.msra.mxu0 %v2109_v39 }
 0x810   :  { %1990 = vmatprep.subr.bf16.mxu0 %v2287_v0 }
 0x87d   :  { %v925_v23 = vpop.xlane.xlu0 %924 }
 0x87e   :  { %v926_v24 = vsub.f32 %v917_v18, %v925_v23 }
 0x880   :  { %v927_v25 = vmul.f32 1.442695, %v926_v24 }
 0x881   :  { %v936_v26 = vpop.permute.xlu0 %935 }
 0x882   :  { %2130 = vpow2.f32 %v927_v25  ;;  %1971 = vmatpush3.bf16.msra.mxu1 %v936_v26 }
 0x883   :  { %1984 = vmatprep.subr.bf16.mxu1 %v2287_v0 }
 0x88f   :  { %v2131_v27 = vpop.eup %2130 }
 0x890   :  { %v929_v30 = vsel %vm409_vm3, %v2131_v27, 0.0 }
 0x891   :  { %930 = vadd.xlane.f32.xlu1 %v929_v30 }
 0x8ad   :  { %v865_v32 = vpop.f32.mrf.mxu1 }
 0x8ae   :  { %v871_v33 = vadd.f32 %v865_v32, %v700_v31 }
 0x8af   :  { %v1962_v34 = vpop.f32.mrf.mxu1 }
 0x8b1   :  { %v868_v36 = vpop.f32.mrf.mxu1 }
 0x8b3   :  { %v1963_v38 = vpop.f32.mrf.mxu1 }
 0x91a   :  { %v931_v40 = vpop.xlane.xlu1 %930 }
 0x91b   :  { %2132 = vrcp.f32 %v931_v40 }
 0x928   :  { %v2133_v41 = vpop.eup %2132 }
 0x929   :  { %v933_v42 = vmul.f32 %v2133_v41, %v2131_v27 }
 0x92b   :  { %v934_v43 = vpack.c.bf16 %v933_v42, %v933_v42 }
 0x92d   :  { %1973 = vmatmul.mubr.msk.bf16.vlgmr.msra.gmra.mxu1 %vm409_vm3, %v934_v43 }
 0x92e   :  { %1985 = vmatpush3.bf16.xpose.msra.mxu1 %v1049_v29  ;;  %1986 = vmatprep.mubr.msk.bf16.mxu1 %vm2289_vm0, %v2287_v0 }
 0x92f   :  { %1996 = vmatprep.subr.bf16.mxu1 %v2287_v0 }
 0x935   :  { %1987 = vmatmul.mubr.msk.bf16.vlgmr.msra.gmra.mxu1 %vm362_vm2, %v2497_v44 }
 0x936   :  { %2000 = vmatprep.mubr.msk.bf16.mxu1 %vm2289_vm0, %v2287_v0  ;;  %1997 = vmatpush3.bf16.msra.mxu1 %v2110_v7 }
 0x937   :  { %1998 = vmatprep.subr.bf16.mxu1 %v2287_v0 }
 0x93a   :  { %1999 = vmatpush3.bf16.msra.mxu1 %v2111_v14 }
 0x93b   :  { %2010 = vmatprep.subr.bf16.mxu1 %v2287_v0 }
 0x9ed   :  { %v975_v47 = vpop.f32.mrf.mxu1 }
 0x9ee   :  { %v982_v49 = vpack.c.bf16 %v975_v47, %v975_v47 }
 0x9ef   :  { %v1974_v52 = vpop.f32.mrf.mxu1 }
 0x9f0   :  { %1981 = vmatmul.mubr.msk.bf16.vlgmr.msra.gmra.mxu0 %vm362_vm2, %v982_v49 }
 0x9f1   :  { %1991 = vmatpush3.bf16.msra.mxu0 %v2507_v51  ;;  %v978_v48 = vpop.f32.mrf.mxu1  ;;  %1992 = vmatprep.mubr.msk.bf16.mxu0 %vm2289_vm0, %v2287_v0 }
 0x9f2   :  { %2004 = vmatprep.subr.bf16.mxu0 %v2287_v0 }
 0x9f3   :  { %v1975_v53 = vpop.f32.mrf.mxu1 }
 0x9f5   :  { %v1085_v50 = vpop.f32.mrf.mxu1 }
 0x9f6   :  { %v1091_v56 = vsel %vm409_vm3, %v1085_v50, -inf }
 0x9f7   :  { %1092 = vmax.xlane.f32.xlu0 %v1091_v56  ;;  %v1988_v28 = vpop.f32.mrf.mxu1 }
 0x9f9   :  { %v1088_v55 = vpop.f32.mrf.mxu1 }
 0x9fb   :  { %v1989_v57 = vpop.f32.mrf.mxu1 }
 0xa0d   :  { %1209 = vrot.lane.b32.xlu0 %v2497_v44, %s2290_s5 }
 0xa80   :  { %v1093_v58 = vpop.xlane.xlu0 %1092 }
 0xa81   :  { %v1094_v59 = vsub.f32 %v1085_v50, %v1093_v58 }
 0xa83   :  { %v1095_v60 = vmul.f32 1.442695, %v1094_v59 }
 0xa84   :  { %v1210_v13 = vpop.permute.xlu0 %1209 }
 0xa85   :  { %2134 = vpow2.f32 %v1095_v60 }
 0xa92   :  { %v2135_v61 = vpop.eup %2134 }
 0xa93   :  { %v1097_v62 = vsel %vm409_vm3, %v2135_v61, 0.0 }
 0xa94   :  { %1098 = vadd.xlane.f32.xlu1 %v1097_v62 }
 0xaa5   :  { %1212 = vrot.lane.b32.xlu1 %v2417_v54, %s2290_s5 }
 0xab0   :  { %v1036_v63 = vpop.f32.mrf.mxu0 }
 0xab1   :  { %v1042_v2 = vadd.f32 %v1036_v63, %v871_v33 }
 0xab2   :  { %v1982_v3 = vpop.f32.mrf.mxu0 }
 0xab3   :  { %v1733_v4 = vadd.f32 %v2523_v1, %v1042_v2 }
 0xab4   :  { %v1039_v5 = vpop.f32.mrf.mxu0 }
 0xab5   :  { %1735 = vst [vmem:[#allocation12] sm:$0xff] %v1733_v4 }
 0xab6   :  { %v1983_v6 = vpop.f32.mrf.mxu0 }
 0xb1d   :  { %v1099_v8 = vpop.xlane.xlu1 %1098 }
 0xb1e   :  { %2136 = vrcp.f32 %v1099_v8 }
 0xb21   :  { %v1213_v11 = vpop.permute.xlu1 %1212 }
 0xb22   :  { %v1218_v12 = vsel %vm362_vm2, %v1213_v11, 0 }
 0xb2b   :  { %v2137_v9 = vpop.eup %2136 }
 0xb2c   :  { %v1101_v10 = vmul.f32 %v2137_v9, %v2135_v61 }
 0xb2e   :  { %v1102_v35 = vpack.c.bf16 %v1101_v10, %v1101_v10 }
 0xb30   :  { %1993 = vmatmul.mubr.msk.bf16.vlgmr.msra.gmra.mxu0 %vm409_vm3, %v1102_v35  ;;  %v2115_v35 = vld [vmem:[#allocation11 + $0x20] sm:$0xff]  }
 0xb31   :  { %2005 = vmatpush3.bf16.xpose.msra.mxu0 %v1218_v12  ;;  %2006 = vmatprep.mubr.msk.bf16.mxu0 %vm2289_vm0, %v2287_v0 }
 0xb32   :  { %2016 = vmatprep.subr.bf16.mxu0 %v2287_v0 }
 0xb38   :  { %2007 = vmatmul.mubr.msk.bf16.vlgmr.msra.gmra.mxu0 %vm362_vm2, %v1210_v13 }
 0xb39   :  { %2020 = vmatprep.mubr.msk.bf16.mxu0 %vm2289_vm0, %v2287_v0  ;;  %2017 = vmatpush3.bf16.msra.mxu0 %v2112_v37 }
 0xb3a   :  { %2018 = vmatprep.subr.bf16.mxu0 %v2287_v0 }
 0xb3d   :  { %2019 = vmatpush3.bf16.msra.mxu0 %v2113_v46 }
 0xb3e   :  { %2030 = vmatprep.subr.bf16.mxu0 %v2287_v0 }
 0xbf0   :  { %v1140_v15 = vpop.f32.mrf.mxu0 }
 0xbf1   :  { %v1147_v16 = vpack.c.bf16 %v1140_v15, %v1140_v15 }
 0xbf2   :  { %v1994_v17 = vpop.f32.mrf.mxu0 }
 0xbf3   :  { %2001 = vmatmul.mubr.msk.bf16.vlgmr.msra.gmra.mxu1 %vm362_vm2, %v1147_v16 }
 0xbf4   :  { %v1143_v18 = vpop.f32.mrf.mxu0  ;;  %2012 = vmatprep.mubr.msk.bf16.mxu1 %vm2289_vm0, %v2287_v0 }
 0xbf6   :  { %v1995_v19 = vpop.f32.mrf.mxu0 }
 0xbf8   :  { %v1254_v20 = vpop.f32.mrf.mxu0 }
 0xbf9   :  { %v1260_v21 = vsel %vm409_vm3, %v1254_v20, -inf }
 0xbfa   :  { %1261 = vmax.xlane.f32.xlu1 %v1260_v21  ;;  %v2008_v22 = vpop.f32.mrf.mxu0 }
 0xbfc   :  { %v1257_v23 = vpop.f32.mrf.mxu0 }
 0xbfe   :  { %v2009_v24 = vpop.f32.mrf.mxu0 }
 0xc0b   :  { %1273 = vrot.lane.b32.xlu1 %v2507_v51, %s2290_s5 }
 0xc0f   :  { %1382 = vrot.lane.b32.xlu1 %v2497_v44, %s2280_s10 }
 0xc83   :  { %v1262_v25 = vpop.xlane.xlu1 %1261 }
 0xc84   :  { %v1263_v26 = vsub.f32 %v1254_v20, %v1262_v25 }
 0xc86   :  { %v1264_v27 = vmul.f32 1.442695, %v1263_v26 }
 0xc87   :  { %v1274_v30 = vpop.permute.xlu1 %1273 }
 0xc88   :  { %2138 = vpow2.f32 %v1264_v27  ;;  %2011 = vmatpush3.bf16.msra.mxu1 %v1274_v30 }
 0xc89   :  { %2024 = vmatprep.subr.bf16.mxu1 %v2287_v0 }
 0xc8b   :  { %v1383_v45 = vpop.permute.xlu1 %1382 }
 0xc95   :  { %v2139_v31 = vpop.eup %2138 }
 0xc96   :  { %v1266_v32 = vsel %vm409_vm3, %v2139_v31, 0.0 }
 0xc97   :  { %1267 = vadd.xlane.f32.xlu0 %v1266_v32  ;;  %v2116_v32 = vld [vmem:[#allocation11 + $0x38] sm:$0xff]  }
 0xcad   :  { %1384 = vrot.lane.b32.xlu0 %v2417_v54, %s2280_s10 }
 0xcb3   :  { %v2548_v33 = vpop.f32.mrf.mxu1 }
 0xcb5   :  { %v2002_v34 = vpop.f32.mrf.mxu1 }
 0xcb7   :  { %v1204_v36 = vpop.f32.mrf.mxu1 }
 0xcb9   :  { %v2003_v38 = vpop.f32.mrf.mxu1 }
 0xcba   :  { %v2117_v38 = vld [vmem:[#allocation11 + $0x30] sm:$0xff]  }
 0xd20   :  { %v1268_v39 = vpop.xlane.xlu0 %1267 }
 0xd21   :  { %2140 = vrcp.f32 %v1268_v39 }
 0xd24   :  { %v1385_v42 = vpop.permute.xlu0 %1384 }
 0xd25   :  { %v1390_v29 = vsel %vm362_vm2, %v1385_v42, 0 }
 0xd2e   :  { %v2141_v40 = vpop.eup %2140 }
 0xd2f   :  { %v1270_v41 = vmul.f32 %v2141_v40, %v2139_v31 }
 0xd31   :  { %v1271_v43 = vpack.c.bf16 %v1270_v41, %v1270_v41 }
 0xd33   :  { %2013 = vmatmul.mubr.msk.bf16.vlgmr.msra.gmra.mxu1 %vm409_vm3, %v1271_v43 }
 0xd34   :  { %2025 = vmatpush3.bf16.xpose.msra.mxu1 %v1390_v29  ;;  %2026 = vmatprep.mubr.msk.bf16.mxu1 %vm2289_vm0, %v2287_v0 }
 0xd35   :  { %2036 = vmatprep.subr.bf16.mxu1 %v2287_v0 }
 0xd3b   :  { %2027 = vmatmul.mubr.msk.bf16.vlgmr.msra.gmra.mxu1 %vm362_vm2, %v1383_v45 }
 0xd3c   :  { %2040 = vmatprep.mubr.msk.bf16.mxu1 %vm2289_vm0, %v2287_v0 }
 0xdf3   :  { %v1313_v47 = vpop.f32.mrf.mxu1 }
 0xdf4   :  { %v1320_v49 = vpack.c.bf16 %v1313_v47, %v1313_v47 }
 0xdf5   :  { %v2014_v52 = vpop.f32.mrf.mxu1 }
 0xdf6   :  { %2021 = vmatmul.mubr.msk.bf16.vlgmr.msra.gmra.mxu0 %vm362_vm2, %v1320_v49 }
 0xdf7   :  { %v1316_v48 = vpop.f32.mrf.mxu1  ;;  %2032 = vmatprep.mubr.msk.bf16.mxu0 %vm2289_vm0, %v2287_v0 }
 0xdf9   :  { %v2015_v53 = vpop.f32.mrf.mxu1 }
 0xdfb   :  { %v1426_v50 = vpop.f32.mrf.mxu1 }
 0xdfc   :  { %v1432_v56 = vsel %vm409_vm3, %v1426_v50, -inf }
 0xdfd   :  { %1433 = vmax.xlane.f32.xlu1 %v1432_v56  ;;  %v2028_v28 = vpop.f32.mrf.mxu1 }
 0xdff   :  { %v1429_v55 = vpop.f32.mrf.mxu1 }
 0xe01   :  { %v2029_v57 = vpop.f32.mrf.mxu1 }
 0xe0e   :  { %1444 = vrot.lane.b32.xlu1 %v2507_v51, %s2280_s10  ;;  %s1742_s10 = sshll.u32 %s2292_s7, 4  ;;  %s1743_s10 = int_to_ptr.vmem [resolvable:$true] %s1742_s10 }
 0xe0f   :  { %s2250_s14 = scalar_lea.vmem %s1743_s10, 256  ;;  %p2255_p12 = scmp.lt.s32.totalorder %s1743_s10, %s1743_s10 }
 0xe10   :  { %p2251_p11 = scmp.ne.s32.totalorder %s1743_s10, %s2250_s14  ;;  %p2256_p13 = scmp.lt.s32.totalorder %s2250_s14, %s2250_s14 }
 0xe12   :  { %1553 = vrot.lane.b32.xlu1 %v2497_v44, %s2291_s3  ;;  %v2114_v44 = vld [vmem:[#allocation11 + $0x28] sm:$0xff]   ;;  %p2257_p0 = por %p2256_p13, %p2255_p12 }
 0xe13   :  { %2037 = vmatpush3.bf16.msra.mxu1 %v2114_v44 }
 0xe14   :  { %2038 = vmatprep.subr.bf16.mxu1 %v2287_v0  ;;  %p2258_p1 = pnand %p2257_p0, %p2251_p11 }
 0xe17   :  { %2039 = vmatpush3.bf16.msra.mxu1 %v2115_v35 }
 0xe18   :  { %2050 = vmatprep.subr.bf16.mxu1 %v2287_v0 }
 0xe86   :  { %v1434_v58 = vpop.xlane.xlu1 %1433 }
 0xe87   :  { %v1435_v59 = vsub.f32 %v1426_v50, %v1434_v58 }
 0xe89   :  { %v1436_v60 = vmul.f32 1.442695, %v1435_v59 }
 0xe8a   :  { %v1445_v61 = vpop.permute.xlu1 %1444 }
 0xe8b   :  { %2142 = vpow2.f32 %v1436_v60  ;;  %2031 = vmatpush3.bf16.msra.mxu0 %v1445_v61 }
 0xe8c   :  { %2044 = vmatprep.subr.bf16.mxu0 %v2287_v0 }
 0xe98   :  { %v2143_v62 = vpop.eup %2142 }
 0xe99   :  { %v1438_v63 = vsel %vm409_vm3, %v2143_v62, 0.0 }
 0xe9a   :  { %1439 = vadd.xlane.f32.xlu0 %v1438_v63 }
 0xeb0   :  { %1555 = vrot.lane.b32.xlu0 %v2417_v54, %s2291_s3  ;;  %v1554_v54 = vpop.permute.xlu1 %1553 }
 0xeb6   :  { %v1374_v2 = vpop.f32.mrf.mxu0 }
 0xeb7   :  { %v1380_v30 = vadd.f32 %v1374_v2, %v2548_v33 }
 0xeb8   :  { %v2022_v3 = vpop.f32.mrf.mxu0 }
 0xeba   :  { %v1377_v4 = vpop.f32.mrf.mxu0 }
 0xebc   :  { %v2023_v5 = vpop.f32.mrf.mxu0 }
 0xf23   :  { %v1440_v6 = vpop.xlane.xlu0 %1439 }
 0xf24   :  { %2144 = vrcp.f32 %v1440_v6 }
 0xf27   :  { %v1556_v9 = vpop.permute.xlu0 %1555 }
 0xf28   :  { %v1561_v11 = vsel %vm362_vm2, %v1556_v9, 0 }
 0xf31   :  { %v2145_v7 = vpop.eup %2144 }
 0xf32   :  { %v1442_v8 = vmul.f32 %v2145_v7, %v2143_v62 }
 0xf34   :  { %v1443_v10 = vpack.c.bf16 %v1442_v8, %v1442_v8 }
 0xf36   :  { %2033 = vmatmul.mubr.msk.bf16.vlgmr.msra.gmra.mxu0 %vm409_vm3, %v1443_v10 }
 0xf37   :  { %2045 = vmatpush3.bf16.xpose.msra.mxu0 %v1561_v11  ;;  %2046 = vmatprep.mubr.msk.bf16.mxu0 %vm2289_vm0, %v2287_v0 }
 0xf38   :  { %2056 = vmatprep.subr.bf16.mxu0 %v2287_v0 }
 0xf3e   :  { %2047 = vmatmul.mubr.msk.bf16.vlgmr.msra.gmra.mxu0 %vm362_vm2, %v1554_v54 }
 0xf3f   :  { %2060 = vmatprep.mubr.msk.bf16.mxu0 %vm2289_vm0, %v2287_v0  ;;  %2057 = vmatpush3.bf16.msra.mxu0 %v2116_v32 }
 0xf40   :  { %2058 = vmatprep.subr.bf16.mxu0 %v2287_v0 }
 0xf43   :  { %2059 = vmatpush3.bf16.msra.mxu0 %v2117_v38 }
 0xff6   :  { %v1484_v12 = vpop.f32.mrf.mxu0 }
 0xff7   :  { %v1491_v13 = vpack.c.bf16 %v1484_v12, %v1484_v12 }
 0xff8   :  { %v2034_v14 = vpop.f32.mrf.mxu0 }
 0xff9   :  { %2041 = vmatmul.mubr.msk.bf16.vlgmr.msra.gmra.mxu1 %vm362_vm2, %v1491_v13 }
 0xffa   :  { %v1487_v15 = vpop.f32.mrf.mxu0  ;;  %2052 = vmatprep.mubr.msk.bf16.mxu1 %vm2289_vm0, %v2287_v0 }
 0xffc   :  { %v2035_v16 = vpop.f32.mrf.mxu0 }
 0xffe   :  { %v1597_v17 = vpop.f32.mrf.mxu0 }
 0xfff   :  { %v1603_v18 = vsel %vm409_vm3, %v1597_v17, -inf }
0x1000   :  { %1604 = vmax.xlane.f32.xlu1 %v1603_v18  ;;  %v2048_v19 = vpop.f32.mrf.mxu0 }
0x1002   :  { %v1600_v20 = vpop.f32.mrf.mxu0 }
0x1004   :  { %v2049_v21 = vpop.f32.mrf.mxu0 }
0x1011   :  { %1615 = vrot.lane.b32.xlu1 %v2507_v51, %s2291_s3 }
0x1089   :  { %v1605_v22 = vpop.xlane.xlu1 %1604 }
0x108a   :  { %v1606_v23 = vsub.f32 %v1597_v17, %v1605_v22 }
0x108c   :  { %v1607_v24 = vmul.f32 1.442695, %v1606_v23 }
0x108d   :  { %v1616_v25 = vpop.permute.xlu1 %1615 }
0x108e   :  { %2146 = vpow2.f32 %v1607_v24  ;;  %2051 = vmatpush3.bf16.msra.mxu1 %v1616_v25 }
0x109b   :  { %v2147_v26 = vpop.eup %2146 }
0x109c   :  { %v1609_v27 = vsel %vm409_vm3, %v2147_v26, 0.0 }
0x109d   :  { %1610 = vadd.xlane.f32.xlu0 %v1609_v27 }
0x10b9   :  { %v1545_v31 = vpop.f32.mrf.mxu1 }
0x10ba   :  { %v1551_v34 = vadd.f32 %v1545_v31, %v1380_v30 }
0x10bb   :  { %v2042_v36 = vpop.f32.mrf.mxu1 }
0x10bd   :  { %v1548_v51 = vpop.f32.mrf.mxu1 }
0x10bf   :  { %v2043_v37 = vpop.f32.mrf.mxu1 }
0x1126   :  { %v1611_v39 = vpop.xlane.xlu0 %1610 }
0x1127   :  { %2148 = vrcp.f32 %v1611_v39 }
0x1134   :  { %v2149_v40 = vpop.eup %2148 }
0x1135   :  { %v1613_v41 = vmul.f32 %v2149_v40, %v2147_v26 }
0x1137   :  { %v1614_v42 = vpack.c.bf16 %v1613_v41, %v1613_v41 }
0x1139   :  { %2053 = vmatmul.mubr.msk.bf16.vlgmr.msra.gmra.mxu1 %vm409_vm3, %v1614_v42 }
0x11f9   :  { %v1655_v43 = vpop.f32.mrf.mxu1 }
0x11fa   :  { %v1662_v33 = vpack.c.bf16 %v1655_v43, %v1655_v43 }
0x11fb   :  { %v2054_v29 = vpop.f32.mrf.mxu1 }
0x11fc   :  { %2061 = vmatmul.mubr.msk.bf16.vlgmr.msra.gmra.mxu0 %vm362_vm2, %v1662_v33 }
0x11fd   :  { %v1658_v45 = vpop.f32.mrf.mxu1 }
0x11ff   :  { %v2055_v46 = vpop.f32.mrf.mxu1 }
0x12bc   :  { %v1716_v47 = vpop.f32.mrf.mxu0 }
0x12bd   :  { %v1722_v0 = vadd.f32 %v1716_v47, %v1551_v34 }
0x12be   :  { %v2062_v49 = vpop.f32.mrf.mxu0 }
0x12bf   :  { %v1734_v52 = vadd.f32 %v2523_v1, %v1722_v0 }
0x12c0   :  { %v1719_v48 = vpop.f32.mrf.mxu0 }
0x12c1   :  { %1736 = vst [vmem:[#allocation12 + $0x8] sm:$0xff] %v1734_v52 }
0x12c2   :  { %v2063_v53 = vpop.f32.mrf.mxu0 }
0x12c3   :  { %2261 = shalt.err (!%p2258_p1)
}
0x12c4   :  { %1748 = dma.vmem_to_hbm [thread:$0]  %s1743_s10, 256, %s2608_s8, [#allocation5], %s2282_s15, %s2282_s15, %s2283_s16  }
0x12c5   :  { %2276 = dma.done.wait [#allocation5], 256  }
0x12c6   :  { %2277 = vsyncadd [#allocation5], 4294967040 }
0x12c7   :  { %1752 = vsyncpa [#allocation4], 1 }
0x12c8   :  { %1753 = vsyncpa [#allocation7], 1 }
0x12c9   :  { %1754 = vsyncpa [#allocation10], 1 }
0x12ca   :  { %1755 = vsyncpa [#allocation5], 1 }

</bundles_post_ra>
